<compile_context>
chip_gen: v5e
topology: v5e:2x2
jax: 0.10.0
libtpu: 0.0.40
codegen_flags: <defaults>
</compile_context>

<pallas_src>
import jax
import jax.numpy as jnp
import numpy as np
from jax.experimental import pallas as pl
from jax.experimental.pallas import tpu as pltpu

H = W = 16          # spatial dims (d2, d3)
C = 4               # input channels (d1)
F = 32              # embedding feature channels
KH = KW = 3         # conv kernel size
K_TAP = KH * KW * C  # 36 im2col taps per pixel per image


# ----------------------------------------------------------------------------
# Fused kernel: conv(block-diag im2col matmul) + ReLU + avg-pool(matmul)
#               + MLP head.  One grid step == one batch row.
# ----------------------------------------------------------------------------
def _fused_kernel(xc_ref, wbd_ref, bc_ref, clin_ref,
                  w1f_ref, w1c_ref, b1_ref, w2_ref, b2_ref, o_ref):
    # xc_ref:   (1, H*W, seq*36)  im2col patches, pixel-major / (seq,tap)-minor
    # wbd_ref:  (seq*36, seq*F)   block-diagonal flattened conv weight
    # bc_ref:   (1, seq*F)        conv bias tiled across seq
    # clin_ref: (1, 1, ni_dim)
    # w1f_ref:  (seq*F, hidden); w1c_ref: (ni_dim, hidden); b1_ref: (1, hidden)
    # w2_ref:   (hidden, out_dim); b2_ref: (1, out_dim)
    # o_ref:    (1, 1, out_dim)
    cols = xc_ref[0]                                              # (HW, seq*36)
    act = jnp.dot(cols, wbd_ref[...], preferred_element_type=jnp.float32)
    act = jnp.maximum(act + bc_ref[...], 0.0)                     # (HW, seq*F) dense

    # Global average pool per image, on the MXU.  The ones/HW row is an
    # in-kernel constant (nothing shipped from HBM); the result is already the
    # flattened (1, seq*F) feature row in s-major / f-minor order.
    hw = cols.shape[0]
    pool_row = jnp.full((1, hw), 1.0 / hw, dtype=jnp.float32)
    feats = jnp.dot(pool_row, act, preferred_element_type=jnp.float32)  # (1, seq*F)

    # Prediction head: Linear -> ReLU -> Linear.  PyTorch's concat is folded
    # into the split w1 (feat part / clin part), so the whole head is 3 dots.
    h = (jnp.dot(feats, w1f_ref[...], preferred_element_type=jnp.float32)
         + jnp.dot(clin_ref[0], w1c_ref[...], preferred_element_type=jnp.float32)
         + b1_ref[...])
    h = jnp.maximum(h, 0.0)
    o_ref[0] = (jnp.dot(h, w2_ref[...], preferred_element_type=jnp.float32)
                + b2_ref[...])


# ----------------------------------------------------------------------------
# Wrapper
# ----------------------------------------------------------------------------
def _im2col_grouped(x):
    # x: (bs, seq, C, H, W) -> (bs, H*W, seq*KH*KW*C); single fused layout
    # pass (transpose + pad + tap-concat + regroup fuse under jit).
    bs, seq = x.shape[0], x.shape[1]
    x_nhwc = jnp.transpose(x, (0, 1, 3, 4, 2))                    # (bs,seq,H,W,C)
    xp = jnp.pad(x_nhwc, ((0, 0), (0, 0), (1, 1), (1, 1), (0, 0)))
    taps = [xp[:, :, dy:dy + H, dx:dx + W, :]
            for dy in range(KH) for dx in range(KW)]
    cols = jnp.concatenate(taps, axis=-1)                         # (bs,seq,H,W,36)
    cols = jnp.transpose(cols, (0, 2, 3, 1, 4))                   # (bs,H,W,seq,36)
    return cols.reshape(bs, H * W, seq * K_TAP)


def gradcam_forward(x, clin_vars, params):
    # x: (bs, seq_len, d1, d2, d3) == (bs, seq_len, C, H, W)
    bs, seq_len, d1, d2, d3 = x.shape
    ni_dim = clin_vars.shape[1]
    hidden = params["w1"].shape[1]
    out_dim = params["w2"].shape[1]
    n_feat = seq_len * F
    hw = d2 * d3
    k_bd = seq_len * K_TAP

    x_cols = _im2col_grouped(x)                                   # (bs, hw, seq*36)
    w_flat = params["w_conv"].reshape(K_TAP, F)                   # (36, F)
    # Block-diagonal conv weight: one matmul produces all seq images' features
    # in a fully lane-dense (hw, seq*F) activation.
    w_bd = jnp.kron(jnp.eye(seq_len, dtype=w_flat.dtype), w_flat)  # (seq*36, seq*F)
    b_row = jnp.tile(params["b_conv"], seq_len).reshape(1, n_feat)
    w1_feat = params["w1"][:n_feat]                               # (seq*F, hidden)
    w1_clin = params["w1"][n_feat:]                               # (ni_dim, hidden)

    flops_row = 2 * (hw * k_bd * n_feat + hw * n_feat
                     + n_feat * hidden + ni_dim * hidden + hidden * out_dim)
    bytes_row = 4 * (hw * k_bd + k_bd * n_feat + n_feat + ni_dim
                     + n_feat * hidden + ni_dim * hidden + hidden
                     + hidden * out_dim + out_dim + out_dim)

    out = pl.pallas_call(
        _fused_kernel,
        out_shape=jax.ShapeDtypeStruct((bs, 1, out_dim), jnp.float32),
        grid=(bs,),
        in_specs=[
            pl.BlockSpec((1, hw, k_bd), lambda b: (b, 0, 0)),
            pl.BlockSpec((k_bd, n_feat), lambda b: (0, 0)),
            pl.BlockSpec((1, n_feat), lambda b: (0, 0)),
            pl.BlockSpec((1, 1, ni_dim), lambda b: (b, 0, 0)),
            pl.BlockSpec((n_feat, hidden), lambda b: (0, 0)),
            pl.BlockSpec((ni_dim, hidden), lambda b: (0, 0)),
            pl.BlockSpec((1, hidden), lambda b: (0, 0)),
            pl.BlockSpec((hidden, out_dim), lambda b: (0, 0)),
            pl.BlockSpec((1, out_dim), lambda b: (0, 0)),
        ],
        out_specs=pl.BlockSpec((1, 1, out_dim), lambda b: (b, 0, 0)),
        compiler_params=pltpu.CompilerParams(
            dimension_semantics=("parallel",)),   # bs blocks -> both TCs on v7x
        cost_estimate=pl.CostEstimate(
            flops=bs * flops_row, transcendentals=0,
            bytes_accessed=bs * bytes_row),
    )(x_cols, w_bd, b_row, clin_vars.reshape(bs, 1, ni_dim),
      w1_feat, w1_clin, params["b1"].reshape(1, hidden),
      params["w2"], params["b2"].reshape(1, out_dim))
    return out.reshape(bs, out_dim)


# ----------------------------------------------------------------------------
# Pure-JAX reference (for correctness check)
# ----------------------------------------------------------------------------
def reference_forward(x, clin_vars, params):
    bs, seq_len, c, h, w = x.shape
    xr = x.reshape(bs * seq_len, c, h, w)
    w_oihw = jnp.transpose(params["w_conv"], (3, 2, 0, 1))        # (F, C, 3, 3)
    y = jax.lax.conv_general_dilated(
        xr, w_oihw, (1, 1), ((1, 1), (1, 1)),
        dimension_numbers=("NCHW", "OIHW", "NCHW"))
    y = jnp.maximum(y + params["b_conv"].reshape(1, F, 1, 1), 0.0)
    feat = jnp.mean(y, axis=(2, 3))                               # (N, F)
    feats = feat.reshape(bs, seq_len * F)
    z = jnp.concatenate([feats, clin_vars], axis=-1)
    hid = jnp.maximum(z @ params["w1"] + params["b1"], 0.0)
    return hid @ params["w2"] + params["b2"]


if __name__ == "__main__":
    bs, seq_len = 2, 8
    ni_dim, hidden, out_dim = 6, 32, 3
    d_in = seq_len * F + ni_dim

    key = jax.random.PRNGKey(0)
    ks = jax.random.split(key, 8)
    x = jax.random.normal(ks[0], (bs, seq_len, C, H, W), jnp.float32)
    clin_vars = jax.random.normal(ks[1], (bs, ni_dim), jnp.float32)
    params = {
        "w_conv": jax.random.normal(ks[2], (KH, KW, C, F), jnp.float32) * 0.1,
        "b_conv": jax.random.normal(ks[3], (F,), jnp.float32) * 0.1,
        "w1": jax.random.normal(ks[4], (d_in, hidden), jnp.float32) * 0.1,
        "b1": jax.random.normal(ks[5], (hidden,), jnp.float32) * 0.1,
        "w2": jax.random.normal(ks[6], (hidden, out_dim), jnp.float32) * 0.1,
        "b2": jax.random.normal(ks[7], (out_dim,), jnp.float32) * 0.1,
    }

    fwd = jax.jit(gradcam_forward)
    out = fwd(x, clin_vars, params)
    out = jax.block_until_ready(out)

    ref = reference_forward(x, clin_vars, params)
    np.testing.assert_allclose(np.asarray(out), np.asarray(ref),
                               atol=1e-3, rtol=1e-3)
    print("KERNEL_OK")
</pallas_src>

<mosaic_0001>
module attributes {stable_mosaic.version = 11 : i64} {
  func.func @_fused_kernel(%arg0: i32, %arg1: memref<1x256x288xf32, #tpu.memory_space<vmem>>, %arg2: memref<288x256xf32, #tpu.memory_space<vmem>>, %arg3: memref<1x256xf32, #tpu.memory_space<vmem>>, %arg4: memref<1x1x6xf32, #tpu.memory_space<vmem>>, %arg5: memref<256x32xf32, #tpu.memory_space<vmem>>, %arg6: memref<6x32xf32, #tpu.memory_space<vmem>>, %arg7: memref<1x32xf32, #tpu.memory_space<vmem>>, %arg8: memref<32x3xf32, #tpu.memory_space<vmem>>, %arg9: memref<1x3xf32, #tpu.memory_space<vmem>>, %arg10: memref<1x1x3xf32, #tpu.memory_space<vmem>>) attributes {dimension_semantics = [#tpu.dimension_semantics<parallel>], iteration_bounds = array<i64: 2>, scalar_prefetch = 0 : i64, scratch_operands = 0 : i64, tpu.core_type = #tpu.core_type<tc>, window_params = [{transform_indices = @transform_0, window_bounds = array<i64: 1, 256, 288>}, {pipeline_mode = #tpu.pipeline_mode<synchronous>, transform_indices = @transform_1, window_bounds = array<i64: 288, 256>}, {pipeline_mode = #tpu.pipeline_mode<synchronous>, transform_indices = @transform_2, window_bounds = array<i64: 1, 256>}, {transform_indices = @transform_3, window_bounds = array<i64: 1, 1, 6>}, {pipeline_mode = #tpu.pipeline_mode<synchronous>, transform_indices = @transform_4, window_bounds = array<i64: 256, 32>}, {pipeline_mode = #tpu.pipeline_mode<synchronous>, transform_indices = @transform_5, window_bounds = array<i64: 6, 32>}, {pipeline_mode = #tpu.pipeline_mode<synchronous>, transform_indices = @transform_6, window_bounds = array<i64: 1, 32>}, {pipeline_mode = #tpu.pipeline_mode<synchronous>, transform_indices = @transform_7, window_bounds = array<i64: 32, 3>}, {pipeline_mode = #tpu.pipeline_mode<synchronous>, transform_indices = @transform_8, window_bounds = array<i64: 1, 3>}, {transform_indices = @transform_9, window_bounds = array<i64: 1, 1, 3>}]} {
    %c0 = arith.constant 0 : index
    %c0_0 = arith.constant 0 : index
    %c0_1 = arith.constant 0 : index
    %0 = vector.load %arg1[%c0, %c0_0, %c0_1] : memref<1x256x288xf32, #tpu.memory_space<vmem>>, vector<1x256x288xf32>
    %1 = vector.shape_cast %0 : vector<1x256x288xf32> to vector<256x288xf32>
    %c0_2 = arith.constant 0 : index
    %c0_3 = arith.constant 0 : index
    %2 = vector.load %arg2[%c0_2, %c0_3] : memref<288x256xf32, #tpu.memory_space<vmem>>, vector<288x256xf32>
    %cst = arith.constant dense<0.000000e+00> : vector<256x256xf32>
    %3 = tpu.matmul %1, %2, %cst {dimension_numbers = #tpu.dot_dimension_numbers<[1], [0], [0], [1], [0, 0, 1, 1], [], []>} : vector<256x288xf32>, vector<288x256xf32>, vector<256x256xf32> -> vector<256x256xf32>
    %c0_4 = arith.constant 0 : index
    %c0_5 = arith.constant 0 : index
    %4 = vector.load %arg3[%c0_4, %c0_5] : memref<1x256xf32, #tpu.memory_space<vmem>>, vector<1x256xf32>
    %5 = vector.broadcast %4 : vector<1x256xf32> to vector<256x256xf32>
    %6 = arith.addf %3, %5 : vector<256x256xf32>
    %cst_6 = arith.constant 0.000000e+00 : f32
    %7 = vector.broadcast %cst_6 : f32 to vector<256x256xf32>
    %8 = arith.maximumf %6, %7 : vector<256x256xf32>
    %cst_7 = arith.constant 3.906250e-03 : f32
    %9 = vector.broadcast %cst_7 : f32 to vector<1x256xf32>
    %cst_8 = arith.constant dense<0.000000e+00> : vector<1x256xf32>
    %10 = tpu.matmul %9, %8, %cst_8 {dimension_numbers = #tpu.dot_dimension_numbers<[1], [0], [0], [1], [0, 0, 1, 1], [], []>} : vector<1x256xf32>, vector<256x256xf32>, vector<1x256xf32> -> vector<1x256xf32>
    %c0_9 = arith.constant 0 : index
    %c0_10 = arith.constant 0 : index
    %11 = vector.load %arg5[%c0_9, %c0_10] : memref<256x32xf32, #tpu.memory_space<vmem>>, vector<256x32xf32>
    %cst_11 = arith.constant dense<0.000000e+00> : vector<1x32xf32>
    %12 = tpu.matmul %10, %11, %cst_11 {dimension_numbers = #tpu.dot_dimension_numbers<[1], [0], [0], [1], [0, 0, 1, 1], [], []>} : vector<1x256xf32>, vector<256x32xf32>, vector<1x32xf32> -> vector<1x32xf32>
    %c0_12 = arith.constant 0 : index
    %c0_13 = arith.constant 0 : index
    %c0_14 = arith.constant 0 : index
    %13 = vector.load %arg4[%c0_12, %c0_13, %c0_14] : memref<1x1x6xf32, #tpu.memory_space<vmem>>, vector<1x1x6xf32>
    %14 = vector.shape_cast %13 : vector<1x1x6xf32> to vector<1x6xf32>
    %c0_15 = arith.constant 0 : index
    %c0_16 = arith.constant 0 : index
    %15 = vector.load %arg6[%c0_15, %c0_16] : memref<6x32xf32, #tpu.memory_space<vmem>>, vector<6x32xf32>
    %cst_17 = arith.constant dense<0.000000e+00> : vector<1x32xf32>
    %16 = tpu.matmul %14, %15, %cst_17 {dimension_numbers = #tpu.dot_dimension_numbers<[1], [0], [0], [1], [0, 0, 1, 1], [], []>} : vector<1x6xf32>, vector<6x32xf32>, vector<1x32xf32> -> vector<1x32xf32>
    %17 = arith.addf %12, %16 : vector<1x32xf32>
    %c0_18 = arith.constant 0 : index
    %c0_19 = arith.constant 0 : index
    %18 = vector.load %arg7[%c0_18, %c0_19] : memref<1x32xf32, #tpu.memory_space<vmem>>, vector<1x32xf32>
    %19 = arith.addf %17, %18 : vector<1x32xf32>
    %cst_20 = arith.constant 0.000000e+00 : f32
    %20 = vector.broadcast %cst_20 : f32 to vector<1x32xf32>
    %21 = arith.maximumf %19, %20 : vector<1x32xf32>
    %c0_21 = arith.constant 0 : index
    %c0_22 = arith.constant 0 : index
    %22 = vector.load %arg8[%c0_21, %c0_22] : memref<32x3xf32, #tpu.memory_space<vmem>>, vector<32x3xf32>
    %cst_23 = arith.constant dense<0.000000e+00> : vector<1x3xf32>
    %23 = tpu.matmul %21, %22, %cst_23 {dimension_numbers = #tpu.dot_dimension_numbers<[1], [0], [0], [1], [0, 0, 1, 1], [], []>} : vector<1x32xf32>, vector<32x3xf32>, vector<1x3xf32> -> vector<1x3xf32>
    %c0_24 = arith.constant 0 : index
    %c0_25 = arith.constant 0 : index
    %24 = vector.load %arg9[%c0_24, %c0_25] : memref<1x3xf32, #tpu.memory_space<vmem>>, vector<1x3xf32>
    %25 = arith.addf %23, %24 : vector<1x3xf32>
    %c0_26 = arith.constant 0 : index
    %c0_27 = arith.constant 0 : index
    %c0_28 = arith.constant 0 : index
    %26 = vector.load %arg10[%c0_26, %c0_27, %c0_28] : memref<1x1x3xf32, #tpu.memory_space<vmem>>, vector<1x1x3xf32>
    %27 = vector.shape_cast %26 : vector<1x1x3xf32> to vector<1x3xf32>
    %28 = vector.shape_cast %25 : vector<1x3xf32> to vector<1x1x3xf32>
    tpu.vector_store %arg10[%c0_26, %c0_27, %c0_28], %28 {strides = array<i32>} : memref<1x1x3xf32, #tpu.memory_space<vmem>>, vector<1x1x3xf32>,
    return
  }
  func.func @transform_0(%arg0: i32) -> (i32, i32, i32) {
    %c0_i32 = arith.constant 0 : i32
    %c0_i32_0 = arith.constant 0 : i32
    %c0_i32_1 = arith.constant 0 : i32
    return %arg0, %c0_i32, %c0_i32_0 : i32, i32, i32
  }
  func.func @transform_1(%arg0: i32) -> (i32, i32) {
    %c0_i32 = arith.constant 0 : i32
    %c0_i32_0 = arith.constant 0 : i32
    %c0_i32_1 = arith.constant 0 : i32
    return %c0_i32, %c0_i32_0 : i32, i32
  }
  func.func @transform_2(%arg0: i32) -> (i32, i32) {
    %c0_i32 = arith.constant 0 : i32
    %c0_i32_0 = arith.constant 0 : i32
    %c0_i32_1 = arith.constant 0 : i32
    return %c0_i32, %c0_i32_0 : i32, i32
  }
  func.func @transform_3(%arg0: i32) -> (i32, i32, i32) {
    %c0_i32 = arith.constant 0 : i32
    %c0_i32_0 = arith.constant 0 : i32
    %c0_i32_1 = arith.constant 0 : i32
    return %arg0, %c0_i32, %c0_i32_0 : i32, i32, i32
  }
  func.func @transform_4(%arg0: i32) -> (i32, i32) {
    %c0_i32 = arith.constant 0 : i32
    %c0_i32_0 = arith.constant 0 : i32
    %c0_i32_1 = arith.constant 0 : i32
    return %c0_i32, %c0_i32_0 : i32, i32
  }
  func.func @transform_5(%arg0: i32) -> (i32, i32) {
    %c0_i32 = arith.constant 0 : i32
    %c0_i32_0 = arith.constant 0 : i32
    %c0_i32_1 = arith.constant 0 : i32
    return %c0_i32, %c0_i32_0 : i32, i32
  }
  func.func @transform_6(%arg0: i32) -> (i32, i32) {
    %c0_i32 = arith.constant 0 : i32
    %c0_i32_0 = arith.constant 0 : i32
    %c0_i32_1 = arith.constant 0 : i32
    return %c0_i32, %c0_i32_0 : i32, i32
  }
  func.func @transform_7(%arg0: i32) -> (i32, i32) {
    %c0_i32 = arith.constant 0 : i32
    %c0_i32_0 = arith.constant 0 : i32
    %c0_i32_1 = arith.constant 0 : i32
    return %c0_i32, %c0_i32_0 : i32, i32
  }
  func.func @transform_8(%arg0: i32) -> (i32, i32) {
    %c0_i32 = arith.constant 0 : i32
    %c0_i32_0 = arith.constant 0 : i32
    %c0_i32_1 = arith.constant 0 : i32
    return %c0_i32, %c0_i32_0 : i32, i32
  }
  func.func @transform_9(%arg0: i32) -> (i32, i32, i32) {
    %c0_i32 = arith.constant 0 : i32
    %c0_i32_0 = arith.constant 0 : i32
    %c0_i32_1 = arith.constant 0 : i32
    return %arg0, %c0_i32, %c0_i32_0 : i32, i32, i32
  }
}

</mosaic_0001>

<bundles_post_ra>
// kernel: mul.4
= control target key start
LH: loop header
LB: loop body
LE: loop exit
PB: predicated region body
PF: predicated region fallthrough
CT: control target
= control target key end

     0   :  { %vm39_vm0 = vcmask 261120   ;;  %s170_s0 = inlined_call_operand.vmem [shape: f32[3,3,4,32], index: 0, kind: input, shape index: {}]   ;;  %s171_s1 = inlined_call_operand.vmem [shape: f32[36,32], index: 1, kind: output, shape index: {}]  }
   0x1   :  { %v81_v0 = vld [vmem:[%s170_s0 + $0x20] sm:$0xf]  ;;  %v82_v1 = vld [vmem:[%s170_s0 + $0x1c] sm:$0xf]  ;;  %v83_v2 = vld [vmem:[%s170_s0 + $0x18] sm:$0xf] }
   0x2   :  { %7 = vst [vmem:[#allocation0 + $0x10] sm:$0xf] %v81_v0  ;;  %v84_v3 = vld [vmem:[%s170_s0 + $0x14] sm:$0xf]  ;;  %v85_v4 = vld [vmem:[%s170_s0 + $0x10] sm:$0xf] }
   0x3   :  { %11 = vst [vmem:[#allocation0 + $0x40] sm:$0xf] %v82_v1  ;;  %v86_v5 = vld [vmem:[%s170_s0 + $0xc] sm:$0xf]  ;;  %v87_v6 = vld [vmem:[%s170_s0 + $0x8] sm:$0xf] }
   0x4   :  { %15 = vst [vmem:[#allocation0 + $0x28] sm:$0xf] %v83_v2  ;;  %v88_v7 = vld [vmem:[%s170_s0 + $0x4] sm:$0xf]  ;;  %v36_v8 = vld [vmem:[%s170_s0] sm:$0xf] }
   0x5   :  { %19 = vst [vmem:[#allocation0 + $0x30] sm:$0xf] %v84_v3 }
   0x6   :  { %23 = vst [vmem:[#allocation0 + $0x20] sm:$0xf] %v85_v4 }
   0x7   :  { %27 = vst [vmem:[#allocation0 + $0x18] sm:$0xf] %v86_v5 }
   0x8   :  { %31 = vst [vmem:[#allocation0] sm:$0xf] %v87_v6 }
   0x9   :  { %35 = vst [vmem:[#allocation0 + $0x8] sm:$0xf] %v88_v7  ;;  %v77_v16 = vld [vmem:[#allocation0 + $0x10] sm:$0xf]  }
   0xa   :  { %37 = vst [vmem:[#allocation0 + $0x38] sm:$0xf] %v36_v8  ;;  %v72_v9 = vld [vmem:[#allocation0 + $0x40] sm:$0xf]  }
   0xb   :  { %v67_v10 = vld [vmem:[#allocation0 + $0x28] sm:$0xf]   ;;  %95 = vst.msk [vmem:[%s171_s1 + $0x1c] sm:$0xf] %vm39_vm0, %v72_v9  }
   0xc   :  { %v62_v11 = vld [vmem:[#allocation0 + $0x30] sm:$0xf]   ;;  %94 = vst.msk [vmem:[%s171_s1 + $0x18] sm:$0xf] %vm39_vm0, %v67_v10  }
   0xd   :  { %v57_v12 = vld [vmem:[#allocation0 + $0x20] sm:$0xf]   ;;  %93 = vst.msk [vmem:[%s171_s1 + $0x14] sm:$0xf] %vm39_vm0, %v62_v11  }
   0xe   :  { %v52_v13 = vld [vmem:[#allocation0 + $0x18] sm:$0xf]   ;;  %92 = vst.msk [vmem:[%s171_s1 + $0x10] sm:$0xf] %vm39_vm0, %v57_v12  }
   0xf   :  { %v47_v14 = vld [vmem:[#allocation0] sm:$0xf]   ;;  %91 = vst.msk [vmem:[%s171_s1 + $0xc] sm:$0xf] %vm39_vm0, %v52_v13  }
  0x10   :  { %v42_v15 = vld [vmem:[#allocation0 + $0x8] sm:$0xf]   ;;  %90 = vst.msk [vmem:[%s171_s1 + $0x8] sm:$0xf] %vm39_vm0, %v47_v14  }
  0x11   :  { %v38_v17 = vld [vmem:[#allocation0 + $0x38] sm:$0xf]   ;;  %89 = vst.msk [vmem:[%s171_s1 + $0x4] sm:$0xf] %vm39_vm0, %v42_v15  }
  0x12   :  { %40 = vst.msk [vmem:[%s171_s1] sm:$0xf] %vm39_vm0, %v38_v17  }
  0x13   :  { %96 = vst.msk [vmem:[%s171_s1 + $0x20] sm:$0xf] %vm39_vm0, %v77_v16  }

// kernel: tile.8
= control target key start
LH: loop header
LB: loop body
LE: loop exit
PB: predicated region body
PF: predicated region fallthrough
CT: control target
= control target key end

     0   :  { %s22_s0 = inlined_call_operand.vmem [shape: f32[32], index: 0, kind: input, shape index: {}]   ;;  %s23_s1 = inlined_call_operand.vmem [shape: f32[8,32], index: 1, kind: output, shape index: {}]  }
   0x1   :  { %v4_v0 = vld [vmem:[%s22_s0] ss:$0 sm:$0xff] }
   0x2   :  { %5 = vst [vmem:[%s23_s1] sm:$0xff] %v4_v0 }

// kernel: tile.9
= control target key start
LH: loop header
LB: loop body
LE: loop exit
PB: predicated region body
PF: predicated region fallthrough
CT: control target
= control target key end

     0   :  { %s7_s6 = smov 3  ;;  %s46_s9 = smov 96   ;;  %vm4_vm0 = vcmask 261120   ;;  %vm11_vm1 = vcmask 1048320   ;;  %vm18_vm2 = vcmask 785920   ;;  %vm25_vm3 = vcmask 523520   ;;  %s77_s0 = inlined_call_operand.vmem [shape: f32[8,32], index: 0, kind: input, shape index: {}]   ;;  %s78_s1 = inlined_call_operand.vmem [shape: f32[1,256], index: 1, kind: output, shape index: {}]  }
   0x1   :  { %v39_v0 = vld [vmem:[%s77_s0 + $0x3] ss:$4 sm:%s7_s6]   ;;  %s21_s10 = smov 3  ;;  %s14_s13 = smov 3 }
   0x2   :  { %9 = vrot.lane.b32.xlu0 %v39_v0, %s46_s9  ;;  %v41_v1 = vld [vmem:[%s77_s0 + $0x1] ss:$4 sm:%s21_s10]   ;;  %s47_s14 = smov 32   ;;  %s48_s17 = smov 64  }
   0x3   :  { %23 = vrot.lane.b32.xlu1 %v41_v1, %s47_s14  ;;  %v40_v2 = vld [vmem:[%s77_s0 + $0x2] ss:$4 sm:%s14_s13]   ;;  %s2_s18 = smov 3 }
   0x4   :  { %v3_v3 = vld [vmem:[%s77_s0] ss:$4 sm:%s2_s18]  }
   0x5   :  { %5 = vst.msk [vmem:[#allocation0] ss:$8 sm:$0x3] %vm4_vm0, %v3_v3  }
   0xa   :  { %16 = vrot.lane.b32.xlu0 %v40_v2, %s48_s17 }
  0x74   :  { %v10_v4 = vpop.permute.xlu0 %9  }
  0x75   :  { %12 = vst.msk [vmem:[#allocation0] ss:$8 sm:$0x3] %vm11_vm1, %v10_v4   ;;  %v24_v5 = vpop.permute.xlu1 %23  }
  0x7c   :  { %v17_v6 = vpop.permute.xlu0 %16  }
  0x7d   :  { %19 = vst.msk [vmem:[#allocation0] ss:$8 sm:$0x3] %vm18_vm2, %v17_v6  }
  0x7e   :  { %26 = vst.msk [vmem:[#allocation0] ss:$8 sm:$0x3] %vm25_vm3, %v24_v5  }
  0x85   :  { %v29_v7 = vld [vmem:[#allocation0] sm:$0x1]  ;;  %v34_v8 = vld [vmem:[#allocation0 + $0x8] sm:$0x1] }
  0x86   :  { %32 = vst [vmem:[%s78_s1] sm:$0x1] %v29_v7 }
  0x87   :  { %42 = vst [vmem:[%s78_s1 + $0x1] sm:$0x1] %v34_v8 }

// kernel: gradcam_forward.1
= control target key start
LH: loop header
LB: loop body
LE: loop exit
PB: predicated region body
PF: predicated region fallthrough
CT: control target
= control target key end

     0   :  { %14 = vsyncpa [#allocation3], 0  ;;  %s3318_s0 = inlined_call_operand.vmem [shape: f32[2,256,288], index: 0, kind: input, shape index: {}]   ;;  %s3319_s1 = inlined_call_operand.vmem [shape: f32[288,256], index: 1, kind: input, shape index: {}]   ;;  %s3320_s2 = inlined_call_operand.vmem [shape: f32[1,256], index: 2, kind: input, shape index: {}]   ;;  %s3321_s3 = inlined_call_operand.vmem [shape: f32[2,1,6], index: 3, kind: input, shape index: {}]   ;;  %s3322_s4 = inlined_call_operand.vmem [shape: f32[256,32], index: 4, kind: input, shape index: {}]   ;;  %s3323_s5 = inlined_call_operand.vmem [shape: f32[6,32], index: 5, kind: input, shape index: {}]   ;;  %s3324_s6 = inlined_call_operand.vmem [shape: f32[1,32], index: 6, kind: input, shape index: {}]   ;;  %s3325_s7 = inlined_call_operand.vmem [shape: f32[32,3], index: 7, kind: input, shape index: {}]   ;;  %s3326_s8 = inlined_call_operand.vmem [shape: f32[1,3], index: 8, kind: input, shape index: {}]   ;;  %s3327_s9 = inlined_call_operand.hbm [shape: f32[2,1,3], index: 9, kind: output, shape index: {}]  }
   0x1   :  { %16 = vsyncpa [#allocation3 + $0x1], 0  ;;  %s1899_s30 = smov 0   ;;  %s1901_s10 = smov 0  }
   0x2   :  { %s1903_s11 = smov 0   ;;  %s1905_s12 = smov 0  }
   0x3 LB: > { %s1920_s13 = sadd.s32 4294967295, %s1846_s12   ;;  %s1649_s14 = sadd.s32 4294967294, %s1846_s12   ;;  %s1846_s12 = sphi %s1905_s12, %s3486_s12   ;;  %s1842_s11 = sphi %s1903_s11, %s3485_s11   ;;  %s1838_s10 = sphi %s1901_s10, %s3484_s10   ;;  %s1834_s30 = sphi %s1899_s30, %s3483_s30  }
   0x4   : > { %s1924_s15 = sadd.s32 1, %s1846_s12   ;;  %s228_s16 = sadd.s32 1, %s1842_s11 }
   0x5   : > { %s225_s17 = ssub.s32 %s1846_s12, %s1924_s15  ;;  %p238_p0 = scmp.ne.s32.totalorder %s1842_s11, %s1838_s10 }
   0x6   : > { %p226_p1 = scmp.eq.s32.totalorder %s225_s17, 0  ;;  %p239_p2 = scmp.eq.s32.totalorder %s1920_s13, 1 }
   0x7   : > { %p244_p3 = scmp.ne.s32.totalorder %s1838_s10, %s1834_s30  ;;  %p245_p4 = scmp.eq.s32.totalorder %s1649_s14, 1 }
   0x8   : > { %s1935_s18 = scalar_select %p226_p1, %s1842_s11, %s228_s16  }
   0x9   : > { %p1937_p5 = por %p239_p2, %p238_p0  ;;  %p1941_p6 = por %p245_p4, %p244_p3 }
   0xa   : > { %p1652_p7 = scmp.ge.s32.totalorder %s1846_s12, 1  ;;  %p298_p8 = scmp.lt.s32.totalorder %s1846_s12, 3 }
   0xc   : > { %p299_p9 = pnand %p1652_p7, %p298_p8 }
   0xe   : > { %302 = sbr.rel (%p299_p9) target bundleno = 1032 (0x408), region = 56 }
  0x13   : > { %v470_v0 = vld [vmem:[%s3319_s1 + $0xf0] sm:$0xff]  ;;  %v468_v1 = vld [vmem:[%s3319_s1 + $0xe0] sm:$0xff]  ;;  %p336_p10 = scmp.lt.s32.totalorder %s1920_s13, 1  ;;  %vm518_vm0 = vcmask 261120   ;;  %vm1475_vm1 = vcmask 1045504   ;;  %vm1471_vm2 = vcmask 48128   ;;  %s1581_s21 = scalar_lea.hbm %s3327_s9, %s1920_s13 }
  0x14   : > { %1723 = vmatpush.msra.mxu1 %v470_v0  ;;  %615 = vmatpush.msra.mxu0 %v470_v0  ;;  %v510_v2 = vld [vmem:[%s3319_s1 + $0x230] sm:$0xff]  ;;  %v508_v3 = vld [vmem:[%s3319_s1 + $0x220] sm:$0xff]  ;;  %s1585_s25 = sshll.u32 %s1581_s21, 4  ;;  %vm1570_vm3 = vcmask 16384   ;;  %s1804_s14 = scalar_lea.hbm %s3327_s9, 2  ;;  %s1586_s25 = int_to_ptr.hbm [resolvable:$true] %s1585_s25 }
  0x15   : > { %v466_v4 = vld [vmem:[%s3319_s1 + $0xd0] sm:$0xff]  ;;  %853 = vmatpush.msra.mxu2 %v510_v2  ;;  %s1964_s16 = scalar_select %p336_p10, %s1920_s13, 1  ;;  %1739 = vmatpush.msra.mxu3 %v510_v2  ;;  %v464_v6 = vld [vmem:[%s3319_s1 + $0xc0] sm:$0xff] }
  0x16   : > { %1724 = vmatpush.msra.mxu1 %v468_v1  ;;  %616 = vmatpush.msra.mxu0 %v468_v1  ;;  %v506_v5 = vld [vmem:[%s3319_s1 + $0x210] sm:$0xff]  ;;  %v504_v7 = vld [vmem:[%s3319_s1 + $0x200] sm:$0xff]  ;;  %s1798_s28 = sshra.s32 %s1586_s25, 4  ;;  %s1799_s28 = int_to_ptr.hbm [resolvable:$true] %s1798_s28 }
  0x17   : > { %854 = vmatpush.msra.mxu2 %v508_v3  ;;  %s1743_s24 = smul.u32 768, %s1964_s16  ;;  %1740 = vmatpush.msra.mxu3 %v508_v3  ;;  %v462_v8 = vld [vmem:[%s3319_s1 + $0xb0] sm:$0xff]  ;;  %v460_v10 = vld [vmem:[%s3319_s1 + $0xa0] sm:$0xff]  ;;  %s343_s26 = scalar_lea.vmem %s3321_s3, %s1964_s16 }
  0x18   : > { %1725 = vmatpush.msra.mxu1 %v466_v4  ;;  %617 = vmatpush.msra.mxu0 %v466_v4  ;;  %v458_v11 = vld [vmem:[%s3319_s1 + $0x90] sm:$0xff]  ;;  %v456_v12 = vld [vmem:[%s3319_s1 + $0x80] sm:$0xff]  ;;  %p1805_p0 = scmp.lt.s32.totalorder %s1799_s28, %s3327_s9 }
  0x19   : > { %855 = vmatpush.msra.mxu2 %v506_v5  ;;  %s1982_s17 = scalar_lea.vmem %s3318_s0, %s1743_s24  ;;  %1741 = vmatpush.msra.mxu3 %v506_v5  ;;  %v454_v13 = vld [vmem:[%s3319_s1 + $0x70] sm:$0xff]  ;;  %v452_v15 = vld [vmem:[%s3319_s1 + $0x60] sm:$0xff] }
  0x1a   : > { %1726 = vmatpush.msra.mxu1 %v464_v6  ;;  %618 = vmatpush.msra.mxu0 %v464_v6  ;;  %v1985_v9 = vld [vmem:[%s1982_s17 + $0x10] sm:$0xff]  ;;  %v2002_v14 = vld [vmem:[%s1982_s17 + $0x28] sm:$0xff]  ;;  %v448_v17 = vld [vmem:[%s3319_s1 + $0x40] sm:$0xff] }
  0x1b   : > { %856 = vmatpush.msra.mxu2 %v504_v7  ;;  %1742 = vmatpush.msra.mxu3 %v504_v7  ;;  %v450_v16 = vld [vmem:[%s3319_s1 + $0x50] sm:$0xff]  ;;  %v2019_v19 = vld [vmem:[%s1982_s17 + $0x40] sm:$0xff]  ;;  %v2033_v23 = vld [vmem:[%s1982_s17 + $0x1f8] sm:$0xff] }
  0x1c   : > { %1727 = vmatpush.msra.mxu1 %v462_v8  ;;  %1654 = vmatmul.msk.f32.vlgmr.msra.gmra.mxu2 %vm518_vm0, %v1985_v9  ;;  %v446_v18 = vld [vmem:[%s3319_s1 + $0x30] sm:$0xff]  ;;  %v444_v20 = vld [vmem:[%s3319_s1 + $0x20] sm:$0xff]  ;;  %v2039_v25 = vld [vmem:[%s1982_s17 + $0x58] sm:$0xff] }
  0x1d   : > { %619 = vmatpush.msra.mxu0 %v462_v8  ;;  %v442_v21 = vld [vmem:[%s3319_s1 + $0x10] sm:$0xff]  ;;  %v440_v22 = vld [vmem:[%s3319_s1] sm:$0xff]  ;;  %v2049_v27 = vld [vmem:[%s1982_s17 + $0x18] sm:$0xff] }
  0x1e   : > { %1728 = vmatpush.msra.mxu1 %v460_v10  ;;  %v2036_v24 = vld [vmem:[%s1982_s17] sm:$0xff]  ;;  %v2046_v26 = vld [vmem:[%s1982_s17 + $0x210] sm:$0xff]  ;;  %v2059_v29 = vld [vmem:[%s1982_s17 + $0x228] sm:$0xff] }
  0x1f   : > { %620 = vmatpush.msra.mxu0 %v460_v10  ;;  %v2052_v28 = vld [vmem:[%s1982_s17 + $0x70] sm:$0xff]  ;;  %v2065_v31 = vld [vmem:[%s1982_s17 + $0x88] sm:$0xff]  ;;  %v2072_v32 = vld [vmem:[%s1982_s17 + $0x240] sm:$0xff] }
  0x20   : > { %1729 = vmatpush.msra.mxu1 %v458_v11  ;;  %v2062_v30 = vld [vmem:[%s1982_s17 + $0x30] sm:$0xff]  ;;  %v2075_v33 = vld [vmem:[%s1982_s17 + $0x48] sm:$0xff]  ;;  %v2078_v34 = vld [vmem:[%s1982_s17 + $0xa0] sm:$0xff] }
  0x21   : > { %621 = vmatpush.msra.mxu0 %v458_v11  ;;  %v502_v35 = vld [vmem:[%s3319_s1 + $0x1f0] sm:$0xff]  ;;  %v500_v36 = vld [vmem:[%s3319_s1 + $0x1e0] sm:$0xff]  ;;  %v2094_v38 = vld [vmem:[%s1982_s17 + $0x258] sm:$0xff] }
  0x22   : > { %1730 = vmatpush.msra.mxu1 %v456_v12  ;;  %v498_v37 = vld [vmem:[%s3319_s1 + $0x1d0] sm:$0xff]  ;;  %v2097_v39 = vld [vmem:[%s1982_s17 + $0x60] sm:$0xff]  ;;  %v2100_v40 = vld [vmem:[%s1982_s17 + $0xb8] sm:$0xff] }
  0x23   : > { %622 = vmatpush.msra.mxu0 %v456_v12  ;;  %v496_v41 = vld [vmem:[%s3319_s1 + $0x1c0] sm:$0xff]  ;;  %v494_v42 = vld [vmem:[%s3319_s1 + $0x1b0] sm:$0xff]  ;;  %v2119_v45 = vld [vmem:[%s1982_s17 + $0x78] sm:$0xff] }
  0x24   : > { %1731 = vmatpush.msra.mxu1 %v454_v13  ;;  %1655 = vmatmul.msk.f32.gmra.mxu2 %vm518_vm0, %v2002_v14  ;;  %v492_v43 = vld [vmem:[%s3319_s1 + $0x1a0] sm:$0xff]  ;;  %v2116_v44 = vld [vmem:[%s1982_s17 + $0x270] sm:$0xff]  ;;  %v2138_v50 = vld [vmem:[%s1982_s17 + $0x288] sm:$0xff] }
  0x25   : > { %623 = vmatpush.msra.mxu0 %v454_v13  ;;  %v2122_v46 = vld [vmem:[%s1982_s17 + $0xd0] sm:$0xff]  ;;  %v488_v48 = vld [vmem:[%s3319_s1 + $0x180] sm:$0xff]  ;;  %v2144_v52 = vld [vmem:[%s1982_s17 + $0xe8] sm:$0xff] }
  0x26   : > { %1732 = vmatpush.msra.mxu1 %v452_v15  ;;  %v490_v47 = vld [vmem:[%s3319_s1 + $0x190] sm:$0xff]  ;;  %v484_v53 = vld [vmem:[%s3319_s1 + $0x160] sm:$0xff]  ;;  %v2163_v57 = vld [vmem:[%s1982_s17 + $0xa8] sm:$0xff] }
  0x27   : > { %624 = vmatpush.msra.mxu0 %v452_v15  ;;  %v486_v49 = vld [vmem:[%s3319_s1 + $0x170] sm:$0xff]  ;;  %v480_v55 = vld [vmem:[%s3319_s1 + $0x140] sm:$0xff]  ;;  %v2169_v59 = vld [vmem:[%s1982_s17 + $0x238] sm:$0xff] }
  0x28   : > { %1733 = vmatpush.msra.mxu1 %v450_v16  ;;  %v2141_v51 = vld [vmem:[%s1982_s17 + $0x90] sm:$0xff]  ;;  %v2160_v56 = vld [vmem:[%s1982_s17 + $0x2a0] sm:$0xff]  ;;  %3346 = vst [vmem:[#allocation6_spill] sm:$0xff] %v2169_v59  ;;  %1677 = vmatmul.msk.f32.vlgmr.msra.gmra.mxu3 %vm518_vm0, %v2169_v59  ;;  %v2187_v63 = vld [vmem:[%s1982_s17 + $0x2b8] sm:$0xff] }
  0x29   : > { %625 = vmatpush.msra.mxu0 %v450_v16  ;;  %v482_v54 = vld [vmem:[%s3319_s1 + $0x150] sm:$0xff]  ;;  %3345 = vst [vmem:[#allocation5_spill] sm:$0xff] %v2160_v56  ;;  %v2166_v58 = vld [vmem:[%s1982_s17 + $0x100] sm:$0xff]  ;;  %v2193_v1 = vld [vmem:[%s1982_s17 + $0x118] sm:$0xff] }
  0x2a   : > { %1734 = vmatpush.msra.mxu1 %v448_v17  ;;  %v478_v60 = vld [vmem:[%s3319_s1 + $0x130] sm:$0xff]  ;;  %v476_v61 = vld [vmem:[%s3319_s1 + $0x120] sm:$0xff]  ;;  %3347 = vst [vmem:[#allocation7_spill] sm:$0xff] %v2187_v63  ;;  %v2211_v5 = vld [vmem:[%s1982_s17 + $0xd8] sm:$0xff] }
  0x2b   : > { %626 = vmatpush.msra.mxu0 %v448_v17  ;;  %v474_v62 = vld [vmem:[%s3319_s1 + $0x110] sm:$0xff]  ;;  %v2190_v0 = vld [vmem:[%s1982_s17 + $0xc0] sm:$0xff]  ;;  %v2217_v7 = vld [vmem:[%s1982_s17 + $0x268] sm:$0xff] }
  0x2c   : > { %1735 = vmatpush.msra.mxu1 %v446_v18  ;;  %1656 = vmatmul.msk.f32.gmra.mxu2 %vm518_vm0, %v2019_v19  ;;  %v2196_v2 = vld [vmem:[%s1982_s17 + $0x250] sm:$0xff]  ;;  %v472_v3 = vld [vmem:[%s3319_s1 + $0x100] sm:$0xff]  ;;  %3350 = vst [vmem:[#allocation10_spill] sm:$0xff] %v2217_v7  ;;  %v2226_v8 = vld [vmem:[%s1982_s17 + $0x2e8] sm:$0xff] }
  0x2d   : > { %627 = vmatpush.msra.mxu0 %v446_v18  ;;  %3348 = vst [vmem:[#allocation8_spill] sm:$0xff] %v2196_v2  ;;  %v2208_v4 = vld [vmem:[%s1982_s17 + $0x2d0] sm:$0xff]  ;;  %v2232_v11 = vld [vmem:[%s1982_s17 + $0x148] sm:$0xff]  ;;  %v2235_v12 = vld [vmem:[%s1982_s17 + $0x280] sm:$0xff] }
  0x2e   : > { %1736 = vmatpush.msra.mxu1 %v444_v20  ;;  %3349 = vst [vmem:[#allocation9_spill] sm:$0xff] %v2208_v4  ;;  %v2214_v6 = vld [vmem:[%s1982_s17 + $0x130] sm:$0xff]  ;;  %v2244_v13 = vld [vmem:[%s1982_s17 + $0x8] sm:$0xff]  ;;  %v2250_v16 = vld [vmem:[%s1982_s17 + $0x160] sm:$0xff] }
  0x2f   : > { %628 = vmatpush.msra.mxu0 %v444_v20  ;;  %3351 = vst [vmem:[#allocation11_spill] sm:$0xff] %v2226_v8  ;;  %v2229_v10 = vld [vmem:[%s1982_s17 + $0xf0] sm:$0xff]  ;;  %v2247_v15 = vld [vmem:[%s1982_s17 + $0x108] sm:$0xff]  ;;  %v2253_v17 = vld [vmem:[%s1982_s17 + $0x298] sm:$0xff] }
  0x30   : > { %1737 = vmatpush.msra.mxu1 %v442_v21  ;;  %1678 = vmatmul.msk.f32.gmra.mxu3 %vm518_vm0, %v2196_v2  ;;  %3352 = vst [vmem:[#allocation12_spill] sm:$0xff] %v2235_v12  ;;  %v2262_v18 = vld [vmem:[%s1982_s17 + $0x20] sm:$0xff]  ;;  %v2495_v2 = vld [vmem:[%s1982_s17 + $0x1b0] sm:$0xff] }
  0x31   : > { %629 = vmatpush.msra.mxu0 %v442_v21  ;;  %3353 = vst [vmem:[#allocation13_spill] sm:$0xff] %v2253_v17  ;;  %v2265_v20 = vld [vmem:[%s1982_s17 + $0x120] sm:$0xff]  ;;  %v2268_v21 = vld [vmem:[%s1982_s17 + $0x178] sm:$0xff] }
  0x32   : > { %1738 = vmatpush.msra.mxu1 %v440_v22 }
  0x33   : > { %694 = vmatmul.f32.vlgmr.msra.gmra.mxu1 %v2033_v23  ;;  %630 = vmatpush.msra.mxu0 %v440_v22  ;;  %v2271_v22 = vld [vmem:[%s1982_s17 + $0x2b0] sm:$0xff] }
  0x34   : > { %631 = vmatmul.f32.vlgmr.msra.gmra.mxu0 %v2036_v24  ;;  %1657 = vmatmul.msk.f32.gmra.mxu2 %vm518_vm0, %v2039_v25  ;;  %3354 = vst [vmem:[#allocation14_spill] sm:$0xff] %v2271_v22 }
  0x35   : > { %728 = vmatpush.msrb.mxu1 %v502_v35  ;;  %v471_v35 = vld [vmem:[%s3319_s1 + $0xf8] sm:$0xff] }
  0x36   : > { %954 = vmatpush.msrb.mxu3 %v471_v35  ;;  %v493_v35 = vld [vmem:[%s3319_s1 + $0x1a8] sm:$0xff] }
  0x37   : > { %729 = vmatpush.msrb.mxu1 %v500_v36  ;;  %v503_v36 = vld [vmem:[%s3319_s1 + $0x1f8] sm:$0xff] }
  0x38   : > { %1679 = vmatmul.msk.f32.gmra.mxu3 %vm518_vm0, %v2217_v7  ;;  %1067 = vmatpush.msrb.mxu2 %v503_v36  ;;  %v2440_v7 = vld [vmem:[%s1982_s17 + $0x1d8] sm:$0xff] }
  0x39   : > { %730 = vmatpush.msrb.mxu1 %v498_v37  ;;  %v469_v37 = vld [vmem:[%s3319_s1 + $0xe8] sm:$0xff] }
  0x3a   : > { %955 = vmatpush.msrb.mxu3 %v469_v37  ;;  %v2339_v37 = vld [vmem:[%s1982_s17 + $0x50] sm:$0xff] }
  0x3b   : > { %697 = vmatmul.f32.gmra.mxu1 %v2046_v26 }
  0x3c   : > { %634 = vmatmul.f32.gmra.mxu0 %v2049_v27  ;;  %1658 = vmatmul.msk.f32.gmra.mxu2 %vm518_vm0, %v2052_v28 }
  0x3d   : > { %731 = vmatpush.msrb.mxu1 %v496_v41  ;;  %v467_v41 = vld [vmem:[%s3319_s1 + $0xd8] sm:$0xff] }
  0x3e   : > { %956 = vmatpush.msrb.mxu3 %v467_v41  ;;  %v457_v41 = vld [vmem:[%s3319_s1 + $0x88] sm:$0xff] }
  0x3f   : > { %732 = vmatpush.msrb.mxu1 %v494_v42  ;;  %v501_v42 = vld [vmem:[%s3319_s1 + $0x1e8] sm:$0xff] }
  0x40   : > { %1680 = vmatmul.msk.f32.gmra.mxu3 %vm518_vm0, %v2235_v12  ;;  %1068 = vmatpush.msrb.mxu2 %v501_v42  ;;  %v491_v42 = vld [vmem:[%s3319_s1 + $0x198] sm:$0xff] }
  0x41   : > { %733 = vmatpush.msrb.mxu1 %v492_v43  ;;  %v2295_v43 = vld [vmem:[%s1982_s17 + $0x38] sm:$0xff] }
  0x43   : > { %700 = vmatmul.f32.gmra.mxu1 %v2059_v29 }
  0x44   : > { %637 = vmatmul.f32.gmra.mxu0 %v2062_v30  ;;  %1659 = vmatmul.msk.f32.gmra.mxu2 %vm518_vm0, %v2065_v31 }
  0x45   : > { %734 = vmatpush.msrb.mxu1 %v490_v47  ;;  %v465_v47 = vld [vmem:[%s3319_s1 + $0xc8] sm:$0xff] }
  0x46   : > { %957 = vmatpush.msrb.mxu3 %v465_v47  ;;  %v2348_v47 = vld [vmem:[%s1982_s17 + $0x150] sm:$0xff] }
  0x47   : > { %735 = vmatpush.msrb.mxu1 %v488_v48  ;;  %v499_v48 = vld [vmem:[%s3319_s1 + $0x1d8] sm:$0xff] }
  0x48   : > { %1681 = vmatmul.msk.f32.gmra.mxu3 %vm518_vm0, %v2253_v17  ;;  %1069 = vmatpush.msrb.mxu2 %v499_v48  ;;  %v2351_v48 = vld [vmem:[%s1982_s17 + $0x1a8] sm:$0xff]  ;;  %v483_v17 = vld [vmem:[%s3319_s1 + $0x158] sm:$0xff] }
  0x49   : > { %736 = vmatpush.msrb.mxu1 %v486_v49  ;;  %v2304_v49 = vld [vmem:[%s1982_s17 + $0x138] sm:$0xff] }
  0x4b   : > { %703 = vmatmul.f32.gmra.mxu1 %v2072_v32 }
  0x4c   : > { %640 = vmatmul.f32.gmra.mxu0 %v2075_v33  ;;  %1660 = vmatmul.msk.f32.gmra.mxu2 %vm518_vm0, %v2078_v34 }
  0x4d   : > { %737 = vmatpush.msrb.mxu1 %v484_v53  ;;  %v2307_v53 = vld [vmem:[%s1982_s17 + $0x190] sm:$0xff] }
  0x4f   : > { %738 = vmatpush.msrb.mxu1 %v482_v54  ;;  %v2310_v54 = vld [vmem:[%s1982_s17 + $0x2c8] sm:$0xff] }
  0x50   : > { %1682 = vmatmul.msk.f32.gmra.mxu3 %vm518_vm0, %v2271_v22  ;;  %3355 = vst [vmem:[#allocation15_spill] sm:$0xff] %v2310_v54  ;;  %v2395_v22 = vld [vmem:[%s1982_s17 + $0x2f8] sm:$0xff] }
  0x51   : > { %739 = vmatpush.msrb.mxu1 %v480_v55  ;;  %v463_v55 = vld [vmem:[%s3319_s1 + $0xb8] sm:$0xff]  ;;  %3359 = vst [vmem:[#allocation19_spill] sm:$0xff] %v2395_v22 }
  0x52   : > { %958 = vmatpush.msrb.mxu3 %v463_v55  ;;  %v2354_v55 = vld [vmem:[%s1982_s17 + $0x2e0] sm:$0xff] }
  0x53   : > { %706 = vmatmul.f32.gmra.mxu1 %v2094_v38  ;;  %3357 = vst [vmem:[#allocation17_spill] sm:$0xff] %v2354_v55 }
  0x54   : > { %643 = vmatmul.f32.gmra.mxu0 %v2097_v39  ;;  %1661 = vmatmul.msk.f32.gmra.mxu2 %vm518_vm0, %v2100_v40 }
  0x55   : > { %740 = vmatpush.msrb.mxu1 %v478_v60  ;;  %v497_v60 = vld [vmem:[%s3319_s1 + $0x1c8] sm:$0xff] }
  0x56   : > { %1070 = vmatpush.msrb.mxu2 %v497_v60  ;;  %v455_v60 = vld [vmem:[%s3319_s1 + $0x78] sm:$0xff] }
  0x57   : > { %741 = vmatpush.msrb.mxu1 %v476_v61  ;;  %v461_v61 = vld [vmem:[%s3319_s1 + $0xa8] sm:$0xff] }
  0x58   : > { %1683 = vmatmul.msk.f32.gmra.mxu3 %vm518_vm0, %v2310_v54  ;;  %v449_v54 = vld [vmem:[%s3319_s1 + $0x48] sm:$0xff] }
  0x59   : > { %742 = vmatpush.msrb.mxu1 %v474_v62  ;;  %v495_v62 = vld [vmem:[%s3319_s1 + $0x1b8] sm:$0xff]  ;;  %959 = vmatpush.msrb.mxu3 %v461_v61  ;;  %v489_v61 = vld [vmem:[%s3319_s1 + $0x188] sm:$0xff] }
  0x5a   : > { %1071 = vmatpush.msrb.mxu2 %v495_v62  ;;  %v453_v62 = vld [vmem:[%s3319_s1 + $0x68] sm:$0xff] }
  0x5b   : > { %709 = vmatmul.f32.gmra.mxu1 %v2116_v44 }
  0x5c   : > { %646 = vmatmul.f32.gmra.mxu0 %v2119_v45  ;;  %1662 = vmatmul.msk.f32.gmra.mxu2 %vm518_vm0, %v2122_v46 }
  0x5d   : > { %743 = vmatpush.msrb.mxu1 %v472_v3  ;;  %v459_v3 = vld [vmem:[%s3319_s1 + $0x98] sm:$0xff]  ;;  %1072 = vmatpush.msrb.mxu2 %v493_v35 }
  0x5e   : > { %960 = vmatpush.msrb.mxu3 %v459_v3  ;;  %v487_v3 = vld [vmem:[%s3319_s1 + $0x178] sm:$0xff] }
  0x5f   : > { %1073 = vmatpush.msrb.mxu2 %v491_v42  ;;  %v451_v35 = vld [vmem:[%s3319_s1 + $0x58] sm:$0xff] }
  0x60   : > { %961 = vmatpush.msrb.mxu3 %v457_v41  ;;  %v485_v41 = vld [vmem:[%s3319_s1 + $0x168] sm:$0xff] }
  0x61   : > { %1684 = vmatmul.msk.f32.gmra.mxu3 %vm518_vm0, %v2354_v55  ;;  %1074 = vmatpush.msrb.mxu2 %v489_v61  ;;  %v2383_v55 = vld [vmem:[%s1982_s17 + $0x68] sm:$0xff]  ;;  %v2392_v61 = vld [vmem:[%s1982_s17 + $0x1c0] sm:$0xff] }
  0x62   : > { %962 = vmatpush.msrb.mxu3 %v455_v60  ;;  %v2389_v60 = vld [vmem:[%s1982_s17 + $0x168] sm:$0xff] }
  0x63   : > { %712 = vmatmul.f32.gmra.mxu1 %v2138_v50  ;;  %1075 = vmatpush.msrb.mxu2 %v487_v3  ;;  %v447_v3 = vld [vmem:[%s3319_s1 + $0x38] sm:$0xff] }
  0x64   : > { %649 = vmatmul.f32.gmra.mxu0 %v2141_v51  ;;  %1663 = vmatmul.msk.f32.gmra.mxu2 %vm518_vm0, %v2144_v52 }
  0x65   : > { %963 = vmatpush.msrb.mxu3 %v453_v62  ;;  %1076 = vmatpush.msrb.mxu2 %v485_v41  ;;  %v511_v62 = vld [vmem:[%s3319_s1 + $0x238] sm:$0xff] }
  0x66   : > { %1192 = vmatpush.msrb.mxu0 %v511_v62  ;;  %v479_v41 = vld [vmem:[%s3319_s1 + $0x138] sm:$0xff]  ;;  %v477_v62 = vld [vmem:[%s3319_s1 + $0x128] sm:$0xff] }
  0x67   : > { %964 = vmatpush.msrb.mxu3 %v451_v35  ;;  %v481_v35 = vld [vmem:[%s3319_s1 + $0x148] sm:$0xff]  ;;  %1077 = vmatpush.msrb.mxu2 %v483_v17  ;;  %v2429_v17 = vld [vmem:[%s1982_s17 + $0x80] sm:$0xff] }
  0x69   : > { %1685 = vmatmul.msk.f32.gmra.mxu3 %vm518_vm0, %v2395_v22  ;;  %1078 = vmatpush.msrb.mxu2 %v481_v35  ;;  %v441_v35 = vld [vmem:[%s3319_s1 + $0x8] sm:$0xff] }
  0x6a   : > { %965 = vmatpush.msrb.mxu3 %v449_v54  ;;  %v445_v54 = vld [vmem:[%s3319_s1 + $0x28] sm:$0xff] }
  0x6b   : > { %715 = vmatmul.f32.gmra.mxu1 %v2160_v56  ;;  %1079 = vmatpush.msrb.mxu2 %v479_v41  ;;  %v509_v41 = vld [vmem:[%s3319_s1 + $0x228] sm:$0xff] }
  0x6c   : > { %652 = vmatmul.f32.gmra.mxu0 %v2163_v57  ;;  %1664 = vmatmul.msk.f32.gmra.mxu2 %vm518_vm0, %v2166_v58 }
  0x6d   : > { %966 = vmatpush.msrb.mxu3 %v447_v3  ;;  %1080 = vmatpush.msrb.mxu2 %v477_v62 }
  0x6e   : > { %1193 = vmatpush.msrb.mxu0 %v509_v41 }
  0x6f   : > { %967 = vmatpush.msrb.mxu3 %v445_v54  ;;  %v475_v54 = vld [vmem:[%s3319_s1 + $0x118] sm:$0xff] }
  0x70   : > { %1081 = vmatpush.msrb.mxu2 %v475_v54  ;;  %v2472_v54 = vld [vmem:[%s1982_s17 + $0x198] sm:$0xff] }
  0x73   : > { %718 = vmatmul.f32.gmra.mxu1 %v2187_v63  ;;  %v2475_v63 = vld [vmem:[%s1982_s17 + $0x1f0] sm:$0xff] }
  0x74   : > { %655 = vmatmul.f32.gmra.mxu0 %v2190_v0  ;;  %1665 = vmatmul.msk.f32.gmra.mxu2 %vm518_vm0, %v2193_v1 }
  0x7b   : > { %721 = vmatmul.f32.gmra.mxu1 %v2208_v4  ;;  %v2437_v4 = vld [vmem:[%s1982_s17 + $0x180] sm:$0xff] }
  0x7c   : > { %658 = vmatmul.f32.gmra.mxu0 %v2211_v5  ;;  %1666 = vmatmul.msk.f32.gmra.mxu2 %vm518_vm0, %v2214_v6 }
  0x83   : > { %724 = vmatmul.f32.gmra.mxu1 %v2226_v8  ;;  %v443_v8 = vld [vmem:[%s3319_s1 + $0x18] sm:$0xff] }
  0x84   : > { %661 = vmatmul.f32.gmra.mxu0 %v2229_v10  ;;  %1667 = vmatmul.msk.f32.gmra.mxu2 %vm518_vm0, %v2232_v11 }
  0x85   : > { %968 = vmatpush.msrb.mxu3 %v443_v8  ;;  %v473_v8 = vld [vmem:[%s3319_s1 + $0x108] sm:$0xff] }
  0x86   : > { %1082 = vmatpush.msrb.mxu2 %v473_v8  ;;  %v505_v8 = vld [vmem:[%s3319_s1 + $0x208] sm:$0xff] }
  0x87   : > { %969 = vmatpush.msrb.mxu3 %v441_v35  ;;  %v507_v35 = vld [vmem:[%s3319_s1 + $0x218] sm:$0xff] }
  0x88   : > { %970 = vmatmul.f32.vlgmr.msrb.gmra.mxu3 %v2036_v24  ;;  %1194 = vmatpush.msrb.mxu0 %v507_v35 }
  0x8a   : > { %1195 = vmatpush.msrb.mxu0 %v505_v8  ;;  %v2498_v8 = vld [vmem:[%s1982_s17 + $0x208] sm:$0xff] }
  0x8b   : > { %744 = vmatmul.f32.vlgmr.msrb.gmra.mxu1 %v2244_v13 }
  0x8c   : > { %664 = vmatmul.f32.gmra.mxu0 %v2247_v15  ;;  %1668 = vmatmul.msk.f32.gmra.mxu2 %vm518_vm0, %v2250_v16 }
  0x90   : > { %973 = vmatmul.f32.gmra.mxu3 %v2049_v27 }
  0x93   : > { %747 = vmatmul.f32.gmra.mxu1 %v2262_v18 }
  0x94   : > { %667 = vmatmul.f32.gmra.mxu0 %v2265_v20  ;;  %1669 = vmatmul.msk.f32.gmra.mxu2 %vm518_vm0, %v2268_v21 }
  0x98   : > { %976 = vmatmul.f32.gmra.mxu3 %v2062_v30 }
  0x9b   : > { %750 = vmatmul.f32.gmra.mxu1 %v2295_v43 }
  0x9c   : > { %670 = vmatmul.f32.gmra.mxu0 %v2304_v49  ;;  %1670 = vmatmul.msk.f32.gmra.mxu2 %vm518_vm0, %v2307_v53 }
  0x9f   : > { %v2336_v36 = vpop.f32.mrf.mxu2 }
  0xa0   : > { %3356 = vst [vmem:[#allocation16_spill] sm:$0xff] %v2336_v36  ;;  %v2464_v36 = vld [vmem:[%s1982_s17 + $0x98] sm:$0xff]  ;;  %979 = vmatmul.f32.gmra.mxu3 %v2075_v33 }
  0xa3   : > { %753 = vmatmul.f32.gmra.mxu1 %v2339_v37 }
  0xa4   : > { %673 = vmatmul.f32.gmra.mxu0 %v2348_v47  ;;  %1671 = vmatmul.msk.f32.gmra.mxu2 %vm518_vm0, %v2351_v48 }
  0xa7   : > { %v2380_v42 = vpop.f32.mrf.mxu2 }
  0xa8   : > { %3358 = vst [vmem:[#allocation18_spill] sm:$0xff] %v2380_v42  ;;  %982 = vmatmul.f32.gmra.mxu3 %v2097_v39 }
  0xab   : > { %756 = vmatmul.f32.gmra.mxu1 %v2383_v55 }
  0xac   : > { %676 = vmatmul.f32.gmra.mxu0 %v2389_v60  ;;  %1672 = vmatmul.msk.f32.gmra.mxu2 %vm518_vm0, %v2392_v61 }
  0xaf   : > { %v2421_v22 = vpop.f32.mrf.mxu2 }
  0xb0   : > { %3360 = vst [vmem:[#allocation20_spill] sm:$0xff] %v2421_v22  ;;  %v2426_v12 = vpop.f32.mrf.mxu1  ;;  %v2510_v22 = vld [vmem:[%s1982_s17 + $0xc8] sm:$0xff]  ;;  %985 = vmatmul.f32.gmra.mxu3 %v2119_v45 }
  0xb1   : > { %3361 = vst [vmem:[#allocation21_spill] sm:$0xff] %v2426_v12  ;;  %v2434_v3 = vpop.f32.mrf.mxu0 }
  0xb2   : > { %3362 = vst [vmem:[#allocation22_spill] sm:$0xff] %v2434_v3  ;;  %v2515_v3 = vld [vmem:[%s1982_s17 + $0x1c8] sm:$0xff] }
  0xb3   : > { %759 = vmatmul.f32.gmra.mxu1 %v2429_v17 }
  0xb4   : > { %679 = vmatmul.f32.gmra.mxu0 %v2437_v4  ;;  %1673 = vmatmul.msk.f32.gmra.mxu2 %vm518_vm0, %v2440_v7 }
  0xb7   : > { %v2459_v12 = vpop.f32.mrf.mxu2 }
  0xb8   : > { %3363 = vst [vmem:[#allocation23_spill] sm:$0xff] %v2459_v12  ;;  %v2461_v62 = vpop.f32.mrf.mxu1  ;;  %988 = vmatmul.f32.gmra.mxu3 %v2141_v51 }
  0xb9   : > { %3364 = vst [vmem:[#allocation24_spill] sm:$0xff] %v2461_v62  ;;  %v2469_v24 = vpop.f32.mrf.mxu0  ;;  %v2490_v62 = vld [vmem:[%s1982_s17 + $0xb0] sm:$0xff] }
  0xba   : > { %3365 = vst [vmem:[#allocation25_spill] sm:$0xff] %v2469_v24  ;;  %v2530_v24 = vld [vmem:[%s1982_s17 + $0xe0] sm:$0xff] }
  0xbb   : > { %762 = vmatmul.f32.gmra.mxu1 %v2464_v36 }
  0xbc   : > { %682 = vmatmul.f32.gmra.mxu0 %v2472_v54  ;;  %1674 = vmatmul.msk.f32.gmra.mxu2 %vm518_vm0, %v2475_v63 }
  0xbf   : > { %v2485_v41 = vpop.f32.mrf.mxu2 }
  0xc0   : > { %3366 = vst [vmem:[#allocation26_spill] sm:$0xff] %v2485_v41  ;;  %v2487_v35 = vpop.f32.mrf.mxu1  ;;  %v2518_v41 = vld [vmem:[%s1982_s17 + $0x220] sm:$0xff]  ;;  %991 = vmatmul.f32.gmra.mxu3 %v2163_v57 }
  0xc1   : > { %3367 = vst [vmem:[#allocation27_spill] sm:$0xff] %v2487_v35  ;;  %v2492_v42 = vpop.f32.mrf.mxu0 }
  0xc2   : > { %3368 = vst [vmem:[#allocation28_spill] sm:$0xff] %v2492_v42 }
  0xc3   : > { %765 = vmatmul.f32.gmra.mxu1 %v2490_v62 }
  0xc4   : > { %685 = vmatmul.f32.gmra.mxu0 %v2495_v2  ;;  %1675 = vmatmul.msk.f32.gmra.mxu2 %vm518_vm0, %v2498_v8 }
  0xc7   : > { %v2505_v27 = vpop.f32.mrf.mxu2 }
  0xc8   : > { %3369 = vst [vmem:[#allocation29_spill] sm:$0xff] %v2505_v27  ;;  %v2507_v35 = vpop.f32.mrf.mxu1  ;;  %v2535_v27 = vld [vmem:[%s1982_s17 + $0x1e0] sm:$0xff]  ;;  %994 = vmatmul.f32.gmra.mxu3 %v2190_v0 }
  0xc9   : > { %3370 = vst [vmem:[#allocation30_spill] sm:$0xff] %v2507_v35  ;;  %v2512_v12 = vpop.f32.mrf.mxu0 }
  0xca   : > { %3371 = vst [vmem:[#allocation31_spill] sm:$0xff] %v2512_v12 }
  0xcb   : > { %768 = vmatmul.f32.gmra.mxu1 %v2510_v22 }
  0xcc   : > { %688 = vmatmul.f32.gmra.mxu0 %v2515_v3  ;;  %1676 = vmatmul.msk.f32.gmra.mxu2 %vm518_vm0, %v2518_v41 }
  0xcf   : > { %v2525_v30 = vpop.f32.mrf.mxu2 }
  0xd0   : > { %3372 = vst [vmem:[#allocation32_spill] sm:$0xff] %v2525_v30  ;;  %v2527_v35 = vpop.f32.mrf.mxu1  ;;  %v2560_v30 = vld [vmem:[%s1982_s17 + $0x110] sm:$0xff]  ;;  %997 = vmatmul.f32.gmra.mxu3 %v2211_v5 }
  0xd1   : > { %3373 = vst [vmem:[#allocation33_spill] sm:$0xff] %v2527_v35  ;;  %v2532_v56 = vpop.f32.mrf.mxu0  ;;  %v2546_v35 = vld [vmem:[%s1982_s17 + $0xf8] sm:$0xff] }
  0xd3   : > { %771 = vmatmul.f32.gmra.mxu1 %v2530_v24 }
  0xd4   : > { %691 = vmatmul.f32.gmra.mxu0 %v2535_v27  ;;  %1083 = vmatmul.f32.vlgmr.msrb.gmra.mxu2 %v2244_v13 }
  0xd7   : > { %v2541_v33 = vpop.f32.mrf.mxu2 }
  0xd8   : > { %v2543_v42 = vpop.f32.mrf.mxu1  ;;  %1000 = vmatmul.f32.gmra.mxu3 %v2229_v10 }
  0xd9   : > { %3374 = vst [vmem:[#allocation34_spill] sm:$0xff] %v2543_v42  ;;  %v2548_v59 = vpop.f32.mrf.mxu0 }
  0xdb   : > { %774 = vmatmul.f32.gmra.mxu1 %v2546_v35 }
  0xdc   : > { %1086 = vmatmul.f32.gmra.mxu2 %v2262_v18  ;;  %1686 = vmatmul.msk.f32.vlgmr.msrb.gmra.mxu0 %vm518_vm0, %v1985_v9  ;;  %v2574_v18 = vld [vmem:[%s1982_s17 + $0x128] sm:$0xff] }
  0xdf   : > { %v2555_v13 = vpop.f32.mrf.mxu2 }
  0xe0   : > { %v2557_v39 = vpop.f32.mrf.mxu1  ;;  %1003 = vmatmul.f32.gmra.mxu3 %v2247_v15 }
  0xe1   : > { %3375 = vst [vmem:[#allocation35_spill] sm:$0xff] %v2557_v39  ;;  %v2562_v42 = vpop.f32.mrf.mxu0 }
  0xe3   : > { %777 = vmatmul.f32.gmra.mxu1 %v2560_v30 }
  0xe4   : > { %1089 = vmatmul.f32.gmra.mxu2 %v2295_v43  ;;  %1687 = vmatmul.msk.f32.gmra.mxu0 %vm518_vm0, %v2002_v14  ;;  %v2582_v43 = vpop.f32.mrf.mxu3 }
  0xe5   : > { %3377 = vst [vmem:[#allocation37_spill] sm:$0xff] %v2582_v43  ;;  %v2606_v43 = vld [vmem:[%s1982_s17 + $0x158] sm:$0xff] }
  0xe7   : > { %v2569_v9 = vpop.f32.mrf.mxu2 }
  0xe8   : > { %v2571_v45 = vpop.f32.mrf.mxu1  ;;  %1006 = vmatmul.f32.gmra.mxu3 %v2265_v20 }
  0xe9   : > { %3376 = vst [vmem:[#allocation36_spill] sm:$0xff] %v2571_v45  ;;  %v2576_v39 = vpop.f32.mrf.mxu0  ;;  %v2590_v45 = vld [vmem:[%s1982_s17 + $0x140] sm:$0xff] }
  0xeb   : > { %780 = vmatmul.f32.gmra.mxu1 %v2574_v18 }
  0xec   : > { %1092 = vmatmul.f32.gmra.mxu2 %v2339_v37  ;;  %1688 = vmatmul.msk.f32.gmra.mxu0 %vm518_vm0, %v2019_v19  ;;  %v2598_v19 = vpop.f32.mrf.mxu3 }
  0xed   : > { %3379 = vst [vmem:[#allocation39_spill] sm:$0xff] %v2598_v19  ;;  %v2622_v19 = vld [vmem:[%s1982_s17 + $0x170] sm:$0xff] }
  0xef   : > { %v2585_v14 = vpop.f32.mrf.mxu2 }
  0xf0   : > { %v2587_v51 = vpop.f32.mrf.mxu1  ;;  %1009 = vmatmul.f32.gmra.mxu3 %v2304_v49 }
  0xf1   : > { %3378 = vst [vmem:[#allocation38_spill] sm:$0xff] %v2587_v51  ;;  %v2592_v12 = vpop.f32.mrf.mxu0 }
  0xf3   : > { %783 = vmatmul.f32.gmra.mxu1 %v2590_v45 }
  0xf4   : > { %1095 = vmatmul.f32.gmra.mxu2 %v2383_v55  ;;  %1689 = vmatmul.msk.f32.gmra.mxu0 %vm518_vm0, %v2039_v25  ;;  %v2614_v25 = vpop.f32.mrf.mxu3 }
  0xf5   : > { %3381 = vst [vmem:[#allocation41_spill] sm:$0xff] %v2614_v25  ;;  %v2638_v25 = vld [vmem:[%s1982_s17 + $0x188] sm:$0xff] }
  0xf7   : > { %v2601_v57 = vpop.f32.mrf.mxu2 }
  0xf8   : > { %v2603_v37 = vpop.f32.mrf.mxu1  ;;  %1012 = vmatmul.f32.gmra.mxu3 %v2348_v47 }
  0xf9   : > { %3380 = vst [vmem:[#allocation40_spill] sm:$0xff] %v2603_v37  ;;  %v2608_v51 = vpop.f32.mrf.mxu0 }
  0xfb   : > { %786 = vmatmul.f32.gmra.mxu1 %v2606_v43 }
  0xfc   : > { %1098 = vmatmul.f32.gmra.mxu2 %v2429_v17  ;;  %1690 = vmatmul.msk.f32.gmra.mxu0 %vm518_vm0, %v2052_v28  ;;  %v2630_v28 = vpop.f32.mrf.mxu3 }
  0xfd   : > { %3383 = vst [vmem:[#allocation43_spill] sm:$0xff] %v2630_v28  ;;  %v2654_v28 = vld [vmem:[%s1982_s17 + $0x1a0] sm:$0xff] }
  0xff   : > { %v2617_v0 = vpop.f32.mrf.mxu2 }
 0x100   : > { %v2619_v55 = vpop.f32.mrf.mxu1  ;;  %1015 = vmatmul.f32.gmra.mxu3 %v2389_v60 }
 0x101   : > { %3382 = vst [vmem:[#allocation42_spill] sm:$0xff] %v2619_v55  ;;  %v2624_v37 = vpop.f32.mrf.mxu0 }
 0x103   : > { %789 = vmatmul.f32.gmra.mxu1 %v2622_v19 }
 0x104   : > { %1101 = vmatmul.f32.gmra.mxu2 %v2464_v36  ;;  %1691 = vmatmul.msk.f32.gmra.mxu0 %vm518_vm0, %v2065_v31  ;;  %v2646_v31 = vpop.f32.mrf.mxu3 }
 0x105   : > { %3385 = vst [vmem:[#allocation45_spill] sm:$0xff] %v2646_v31  ;;  %v2670_v31 = vld [vmem:[%s1982_s17 + $0x1b8] sm:$0xff] }
 0x107   : > { %v2633_v5 = vpop.f32.mrf.mxu2 }
 0x108   : > { %v2635_v17 = vpop.f32.mrf.mxu1  ;;  %1018 = vmatmul.f32.gmra.mxu3 %v2437_v4 }
 0x109   : > { %3384 = vst [vmem:[#allocation44_spill] sm:$0xff] %v2635_v17  ;;  %v2640_v55 = vpop.f32.mrf.mxu0 }
 0x10b   : > { %792 = vmatmul.f32.gmra.mxu1 %v2638_v25 }
 0x10c   : > { %1104 = vmatmul.f32.gmra.mxu2 %v2490_v62  ;;  %1692 = vmatmul.msk.f32.gmra.mxu0 %vm518_vm0, %v2078_v34  ;;  %v2662_v34 = vpop.f32.mrf.mxu3 }
 0x10d   : > { %3387 = vst [vmem:[#allocation47_spill] sm:$0xff] %v2662_v34  ;;  %v2686_v34 = vld [vmem:[%s1982_s17 + $0x1d0] sm:$0xff] }
 0x10f   : > { %v2649_v10 = vpop.f32.mrf.mxu2 }
 0x110   : > { %v2651_v36 = vpop.f32.mrf.mxu1  ;;  %1021 = vmatmul.f32.gmra.mxu3 %v2472_v54 }
 0x111   : > { %3386 = vst [vmem:[#allocation46_spill] sm:$0xff] %v2651_v36  ;;  %v2656_v17 = vpop.f32.mrf.mxu0 }
 0x113   : > { %795 = vmatmul.f32.gmra.mxu1 %v2654_v28 }
 0x114   : > { %1107 = vmatmul.f32.gmra.mxu2 %v2510_v22  ;;  %1693 = vmatmul.msk.f32.gmra.mxu0 %vm518_vm0, %v2100_v40  ;;  %v2678_v40 = vpop.f32.mrf.mxu3 }
 0x115   : > { %3389 = vst [vmem:[#allocation49_spill] sm:$0xff] %v2678_v40 }
 0x117   : > { %v2665_v15 = vpop.f32.mrf.mxu2 }
 0x118   : > { %v2667_v62 = vpop.f32.mrf.mxu1  ;;  %1024 = vmatmul.f32.gmra.mxu3 %v2495_v2  ;;  %v512_v2 = vld [vmem:[%s3320_s2] sm:$0x3] }
 0x119   : > { %3388 = vst [vmem:[#allocation48_spill] sm:$0xff] %v2667_v62  ;;  %v2672_v36 = vpop.f32.mrf.mxu0 }
 0x11b   : > { %798 = vmatmul.f32.gmra.mxu1 %v2670_v31 }
 0x11c   : > { %1110 = vmatmul.f32.gmra.mxu2 %v2530_v24  ;;  %1694 = vmatmul.msk.f32.gmra.mxu0 %vm518_vm0, %v2122_v46  ;;  %v2694_v46 = vpop.f32.mrf.mxu3 }
 0x11d   : > { %3392 = vst [vmem:[#allocation52_spill] sm:$0xff] %v2694_v46 }
 0x11f   : > { %v2681_v20 = vpop.f32.mrf.mxu2 }
 0x120   : > { %3390 = vst [vmem:[#allocation50_spill] sm:$0xff] %v2681_v20  ;;  %v2683_v22 = vpop.f32.mrf.mxu1  ;;  %v2702_v20 = vld [vmem:[%s1982_s17 + $0x1e8] sm:$0xff]  ;;  %1027 = vmatmul.f32.gmra.mxu3 %v2515_v3 }
 0x121   : > { %3391 = vst [vmem:[#allocation51_spill] sm:$0xff] %v2683_v22  ;;  %v2688_v62 = vpop.f32.mrf.mxu0  ;;  %v2792_v22 = vld [vmem:[%s1982_s17 + $0x278] sm:$0xff] }
 0x123   : > { %801 = vmatmul.f32.gmra.mxu1 %v2686_v34 }
 0x124   : > { %1113 = vmatmul.f32.gmra.mxu2 %v2546_v35  ;;  %1695 = vmatmul.msk.f32.gmra.mxu0 %vm518_vm0, %v2144_v52  ;;  %v2713_v47 = vpop.f32.mrf.mxu3 }
 0x125   : > { %3395 = vst [vmem:[#allocation55_spill] sm:$0xff] %v2713_v47 }
 0x127   : > { %v2697_v49 = vpop.f32.mrf.mxu2 }
 0x128   : > { %3393 = vst [vmem:[#allocation53_spill] sm:$0xff] %v2697_v49  ;;  %v2699_v24 = vpop.f32.mrf.mxu1  ;;  %v2718_v49 = vld [vmem:[%s1982_s17 + $0x200] sm:$0xff]  ;;  %1030 = vmatmul.f32.gmra.mxu3 %v2535_v27 }
 0x129   : > { %v2704_v40 = vpop.f32.mrf.mxu0 }
 0x12b   : > { %804 = vmatmul.f32.gmra.mxu1 %v2702_v20 }
 0x12c   : > { %1116 = vmatmul.f32.gmra.mxu2 %v2560_v30  ;;  %1696 = vmatmul.msk.f32.gmra.mxu0 %vm518_vm0, %v2166_v58  ;;  %v2732_v30 = vld [vmem:[%s1982_s17 + $0x218] sm:$0xff]  ;;  %v971_v47 = vpop.f32.mrf.mxu3 }
 0x12f   : > { %v2711_v52 = vpop.f32.mrf.mxu2 }
 0x130   : > { %3394 = vst [vmem:[#allocation54_spill] sm:$0xff] %v2711_v52  ;;  %v2715_v35 = vpop.f32.mrf.mxu1  ;;  %1033 = vmatmul.f32.gmra.mxu3 %v2033_v23 }
 0x131   : > { %v2720_v46 = vpop.f32.mrf.mxu0 }
 0x132   : > { %3396 = vst [vmem:[#allocation56_spill] sm:$0xff] %v2720_v46 }
 0x133   : > { %807 = vmatmul.f32.gmra.mxu1 %v2718_v49 }
 0x134   : > { %1119 = vmatmul.f32.gmra.mxu2 %v2574_v18  ;;  %1697 = vmatmul.msk.f32.gmra.mxu0 %vm518_vm0, %v2193_v1  ;;  %v2746_v18 = vld [vmem:[%s1982_s17 + $0x230] sm:$0xff]  ;;  %v974_v46 = vpop.f32.mrf.mxu3 }
 0x137   : > { %v2727_v58 = vpop.f32.mrf.mxu2 }
 0x138   : > { %3397 = vst [vmem:[#allocation57_spill] sm:$0xff] %v2727_v58  ;;  %v2729_v60 = vpop.f32.mrf.mxu1  ;;  %1036 = vmatmul.f32.gmra.mxu3 %v2046_v26 }
 0x139   : > { %v2734_v52 = vpop.f32.mrf.mxu0 }
 0x13a   : > { %3398 = vst [vmem:[#allocation58_spill] sm:$0xff] %v2734_v52 }
 0x13b   : > { %810 = vmatmul.f32.gmra.mxu1 %v2732_v30 }
 0x13c   : > { %1122 = vmatmul.f32.gmra.mxu2 %v2590_v45  ;;  %1698 = vmatmul.msk.f32.gmra.mxu0 %vm518_vm0, %v2214_v6  ;;  %v2760_v45 = vld [vmem:[%s1982_s17 + $0x248] sm:$0xff]  ;;  %v977_v52 = vpop.f32.mrf.mxu3 }
 0x13d   : > { %3402 = vst [vmem:[#allocation62_spill] sm:$0xff] %v2760_v45 }
 0x13f   : > { %v2741_v1 = vpop.f32.mrf.mxu2 }
 0x140   : > { %3399 = vst [vmem:[#allocation59_spill] sm:$0xff] %v2741_v1  ;;  %v2743_v4 = vpop.f32.mrf.mxu1  ;;  %1039 = vmatmul.f32.gmra.mxu3 %v2059_v29 }
 0x141   : > { %v2748_v58 = vpop.f32.mrf.mxu0 }
 0x142   : > { %3400 = vst [vmem:[#allocation60_spill] sm:$0xff] %v2748_v58  ;;  %v2779_v58 = vperm.slane %v512_v2, 1 }
 0x143   : > { %813 = vmatmul.f32.gmra.mxu1 %v2746_v18 }
 0x144   : > { %1125 = vmatmul.f32.gmra.mxu2 %v2606_v43  ;;  %1699 = vmatmul.msk.f32.gmra.mxu0 %vm518_vm0, %v2232_v11  ;;  %v978_v23 = vadd.f32 %v977_v52, %v2779_v58  ;;  %v2833_v52 = vld [vmem:[%s1982_s17 + $0x2c0] sm:$0xff] }
 0x147   : > { %v2755_v6 = vpop.f32.mrf.mxu2 }
 0x148   : > { %3401 = vst [vmem:[#allocation61_spill] sm:$0xff] %v2755_v6  ;;  %v2757_v54 = vpop.f32.mrf.mxu1  ;;  %v2777_v6 = vld [vmem:[%s1982_s17 + $0x260] sm:$0xff]  ;;  %1042 = vmatmul.f32.gmra.mxu3 %v2072_v32 }
 0x149   : > { %v2762_v1 = vpop.f32.mrf.mxu0  ;;  %3405 = vst [vmem:[#allocation65_spill] sm:$0xff] %v2777_v6 }
 0x14a   : > { %3403 = vst [vmem:[#allocation63_spill] sm:$0xff] %v2762_v1 }
 0x14b   : > { %816 = vmatmul.f32.gmra.mxu1 %v2760_v45 }
 0x14c   : > { %1128 = vmatmul.f32.gmra.mxu2 %v2622_v19  ;;  %1700 = vmatmul.msk.f32.gmra.mxu0 %vm518_vm0, %v2250_v16  ;;  %v980_v19 = vpop.f32.mrf.mxu3  ;;  %v972_v16 = vadd.f32 %v971_v47, %v2779_v58  ;;  %v2807_v47 = vld [vmem:[%s1982_s17 + $0x290] sm:$0xff] }
 0x14f   : > { %v2772_v11 = vpop.f32.mrf.mxu2 }
 0x150   : > { %3404 = vst [vmem:[#allocation64_spill] sm:$0xff] %v2772_v11  ;;  %v2774_v43 = vpop.f32.mrf.mxu1  ;;  %1045 = vmatmul.f32.gmra.mxu3 %v2094_v38 }
 0x151   : > { %v2781_v1 = vpop.f32.mrf.mxu0 }
 0x152   : > { %3406 = vst [vmem:[#allocation66_spill] sm:$0xff] %v2781_v1 }
 0x153   : > { %819 = vmatmul.f32.gmra.mxu1 %v2777_v6 }
 0x154   : > { %1131 = vmatmul.f32.gmra.mxu2 %v2638_v25  ;;  %1701 = vmatmul.msk.f32.gmra.mxu0 %vm518_vm0, %v2268_v21  ;;  %v983_v6 = vpop.f32.mrf.mxu3  ;;  %v975_v21 = vadd.f32 %v974_v46, %v2779_v58  ;;  %v2820_v46 = vld [vmem:[%s1982_s17 + $0x2a8] sm:$0xff] }
 0x157   : > { %v1084_v3 = vpop.f32.mrf.mxu2 }
 0x158   : > { %v2789_v11 = vpop.f32.mrf.mxu1  ;;  %v2794_v45 = vadd.f32 %v1084_v3, %v972_v16  ;;  %1048 = vmatmul.f32.gmra.mxu3 %v2116_v44 }
 0x159   : > { %v2796_v1 = vpop.f32.mrf.mxu0 }
 0x15a   : > { %3407 = vst [vmem:[#allocation67_spill] sm:$0xff] %v2794_v45 }
 0x15b   : > { %3408 = vst [vmem:[#allocation68_spill] sm:$0xff] %v2796_v1  ;;  %822 = vmatmul.f32.gmra.mxu1 %v2792_v22 }
 0x15c   : > { %1134 = vmatmul.f32.gmra.mxu2 %v2654_v28  ;;  %1702 = vmatmul.msk.f32.gmra.mxu0 %vm518_vm0, %v2307_v53  ;;  %v986_v1 = vpop.f32.mrf.mxu3 }
 0x15d   : > { %v987_v32 = vadd.f32 %v986_v1, %v2779_v58 }
 0x15f   : > { %v1087_v27 = vpop.f32.mrf.mxu2 }
 0x160   : > { %v2804_v25 = vpop.f32.mrf.mxu1  ;;  %v2809_v16 = vadd.f32 %v1087_v27, %v975_v21  ;;  %1051 = vmatmul.f32.gmra.mxu3 %v2138_v50 }
 0x161   : > { %v2811_v3 = vpop.f32.mrf.mxu0 }
 0x162   : > { %3409 = vst [vmem:[#allocation69_spill] sm:$0xff] %v2809_v16 }
 0x163   : > { %3410 = vst [vmem:[#allocation70_spill] sm:$0xff] %v2811_v3  ;;  %825 = vmatmul.f32.gmra.mxu1 %v2807_v47 }
 0x164   : > { %1137 = vmatmul.f32.gmra.mxu2 %v2670_v31  ;;  %1703 = vmatmul.msk.f32.gmra.mxu0 %vm518_vm0, %v2351_v48  ;;  %v989_v45 = vpop.f32.mrf.mxu3  ;;  %v981_v48 = vadd.f32 %v980_v19, %v2779_v58  ;;  %v2848_v19 = vld [vmem:[%s1982_s17 + $0x2d8] sm:$0xff] }
 0x167   : > { %v1090_v53 = vpop.f32.mrf.mxu2 }
 0x168   : > { %v781_v28 = vpop.f32.mrf.mxu1  ;;  %v2822_v21 = vadd.f32 %v1090_v53, %v978_v23 }
 0x169   : > { %v2824_v27 = vpop.f32.mrf.mxu0 }
 0x16a   : > { %3411 = vst [vmem:[#allocation71_spill] sm:$0xff] %v2822_v21 }
 0x16b   : > { %3412 = vst [vmem:[#allocation72_spill] sm:$0xff] %v2824_v27  ;;  %828 = vmatmul.f32.gmra.mxu1 %v2820_v46  ;;  %v2856_v27 = vperm.slane %v512_v2, 0 }
 0x16c   : > { %1140 = vmatmul.f32.gmra.mxu2 %v2686_v34  ;;  %1704 = vmatmul.msk.f32.gmra.mxu0 %vm518_vm0, %v2392_v61  ;;  %v2839_v3 = vpop.f32.mrf.mxu3  ;;  %v984_v61 = vadd.f32 %v983_v6, %v2779_v58 }
 0x16d   : > { %v678_v6 = vadd.f32 %v2704_v40, %v2856_v27 }
 0x16f   : > { %v1093_v26 = vpop.f32.mrf.mxu2 }
 0x170   : > { %v784_v31 = vpop.f32.mrf.mxu1  ;;  %v2835_v23 = vadd.f32 %v1093_v26, %v981_v48 }
 0x171   : > { %v2837_v53 = vpop.f32.mrf.mxu0 }
 0x172   : > { %3413 = vst [vmem:[#allocation73_spill] sm:$0xff] %v2837_v53 }
 0x173   : > { %831 = vmatmul.f32.gmra.mxu1 %v2833_v52 }
 0x174   : > { %1143 = vmatmul.f32.gmra.mxu2 %v2702_v20  ;;  %1705 = vmatmul.msk.f32.gmra.mxu0 %vm518_vm0, %v2440_v7  ;;  %v2854_v16 = vpop.f32.mrf.mxu3  ;;  %v675_v7 = vadd.f32 %v2688_v62, %v2856_v27  ;;  %v672_v20 = vadd.f32 %v2672_v36, %v2856_v27  ;;  %v666_v36 = vadd.f32 %v2640_v55, %v2856_v27 }
 0x176   : > { %v785_v1 = vadd.f32 %v784_v31, %v672_v20  ;;  %v663_v31 = vadd.f32 %v2624_v37, %v2856_v27 }
 0x177   : > { %v1096_v29 = vpop.f32.mrf.mxu2 }
 0x178   : > { %v787_v34 = vpop.f32.mrf.mxu1  ;;  %v2850_v48 = vadd.f32 %v1096_v29, %v984_v61  ;;  %v898_v55 = vadd.f32 %v2633_v5, %v785_v1  ;;  %v657_v5 = vadd.f32 %v2592_v12, %v2856_v27  ;;  %v993_v12 = vadd.f32 %v2839_v3, %v2779_v58 }
 0x179   : > { %v2852_v26 = vpop.f32.mrf.mxu0  ;;  %v788_v2 = vadd.f32 %v787_v34, %v675_v7 }
 0x17b   : > { %834 = vmatmul.f32.gmra.mxu1 %v2848_v19  ;;  %v901_v34 = vadd.f32 %v2649_v10, %v788_v2  ;;  %v660_v10 = vadd.f32 %v2608_v51, %v2856_v27  ;;  %v770_v2 = vadd.f32 %v2757_v54, %v657_v5  ;;  %v3423_v5 = vld [vmem:[#allocation48_spill] sm:$0xff] }
 0x17c   : > { %1146 = vmatmul.f32.gmra.mxu2 %v2718_v49  ;;  %1706 = vmatmul.msk.f32.gmra.mxu0 %vm518_vm0, %v2475_v63  ;;  %v2871_v49 = vld [vmem:[%s1982_s17 + $0x2f0] sm:$0xff]  ;;  %v669_v63 = vadd.f32 %v2656_v17, %v2856_v27  ;;  %v2879_v38 = vpop.f32.mrf.mxu3  ;;  %v990_v17 = vadd.f32 %v989_v45, %v2779_v58  ;;  %s1800_s17 = scalar_lea.hbm %s1799_s28, 1 }
 0x17d   : > { %p1801_p11 = scmp.ne.s32.totalorder %s1799_s28, %s1800_s17  ;;  %p1806_p1 = scmp.lt.s32.totalorder %s1804_s14, %s1800_s17 }
 0x17e   : > { %v782_v40 = vadd.f32 %v781_v28, %v669_v63 }
 0x17f   : > { %v1099_v61 = vpop.f32.mrf.mxu2  ;;  %p1802_p12 = pnand %p1801_p11, %p1937_p5  ;;  %p1807_p2 = por %p1806_p1, %p1805_p0 }
 0x180   : > { %v790_v29 = vpop.f32.mrf.mxu1  ;;  %v2873_v21 = vadd.f32 %v1099_v61, %v987_v32  ;;  %v779_v32 = vadd.f32 %v2804_v25, %v666_v36  ;;  %v773_v25 = vadd.f32 %v2774_v43, %v660_v10  ;;  %v3420_v10 = vld [vmem:[#allocation29_spill] sm:$0xff] }
 0x181   : > { %v791_v62 = vadd.f32 %v790_v29, %v678_v6  ;;  %v2877_v53 = vpop.f32.mrf.mxu0  ;;  %v1319_v6 = vmax.f32 %v898_v55, 0.0  ;;  %v3419_v55 = vld [vmem:[#allocation51_spill] sm:$0xff]  ;;  %p1803_p13 = pneg %p1802_p12 }
 0x182   : > { %v892_v44 = vadd.f32 %v2601_v57, %v779_v32  ;;  %v651_v57 = vadd.f32 %v2562_v42, %v2856_v27 }
 0x183   : > { %v904_v7 = vadd.f32 %v2665_v15, %v791_v62  ;;  %837 = vmatmul.f32.gmra.mxu1 %v2871_v49  ;;  %v776_v15 = vadd.f32 %v2789_v11, %v663_v31  ;;  %v3418_v31 = vld [vmem:[#allocation28_spill] sm:$0xff]  ;;  %p1808_p3 = pnand %p1807_p2, %p1803_p13 }
 0x184   : > { %1149 = vmatmul.f32.gmra.mxu2 %v2732_v30  ;;  %1707 = vmatmul.msk.f32.gmra.mxu0 %vm518_vm0, %v2498_v8  ;;  %v895_v30 = vadd.f32 %v2617_v0, %v782_v40  ;;  %v1321_v8 = vmax.f32 %v901_v34, 0.0  ;;  %v2909_v11 = vpop.f32.mrf.mxu3  ;;  %v654_v0 = vadd.f32 %v2576_v39, %v2856_v27  ;;  %v886_v39 = vadd.f32 %v2569_v9, %v773_v25  ;;  %v3415_v34 = vld [vmem:[#allocation32_spill] sm:$0xff] }
 0x185   : > { %v1323_v28 = vmax.f32 %v904_v7, 0.0  ;;  %v889_v61 = vadd.f32 %v2585_v14, %v776_v15  ;;  %v1315_v54 = vmax.f32 %v892_v44, 0.0  ;;  %v648_v14 = vadd.f32 %v2548_v59, %v2856_v27  ;;  %v3424_v44 = vld [vmem:[#allocation26_spill] sm:$0xff] }
 0x186   : > { %v1317_v29 = vmax.f32 %v895_v30, 0.0  ;;  %v767_v43 = vadd.f32 %v2743_v4, %v654_v0  ;;  %v645_v9 = vadd.f32 %v2532_v56, %v2856_v27  ;;  %v1311_v59 = vmax.f32 %v886_v39, 0.0  ;;  %v3416_v56 = vld [vmem:[#allocation62_spill] sm:$0xff]  ;;  %v3421_v30 = vld [vmem:[#allocation5_spill] sm:$0xff]  ;;  %v3427_v39 = vld [vmem:[#allocation23_spill] sm:$0xff] }
 0x187   : > { %1357 = vmatpush.msra.mxu1 %v1323_v28  ;;  %v1102_v45 = vpop.f32.mrf.mxu2  ;;  %v1313_v3 = vmax.f32 %v889_v61, 0.0  ;;  %v761_v4 = vadd.f32 %v2715_v35, %v648_v14  ;;  %v3417_v35 = vld [vmem:[#allocation6_spill] sm:$0xff]  ;;  %v639_v32 = vadd.f32 %v3418_v31, %v2856_v27  ;;  %1054 = vmatmul.f32.gmra.mxu3 %v3421_v30  ;;  %v3436_v30 = vld [vmem:[#allocation9_spill] sm:$0xff] }
 0x188   : > { %v2899_v20 = vpop.f32.mrf.mxu1  ;;  %v2901_v37 = vadd.f32 %v1102_v45, %v990_v17  ;;  %v880_v50 = vadd.f32 %v2541_v33, %v767_v43  ;;  %v758_v40 = vadd.f32 %v2699_v24, %v645_v9  ;;  %v996_v33 = vadd.f32 %v2854_v16, %v2779_v58 }
 0x189   : > { %1358 = vmatpush.msra.mxu1 %v1321_v8  ;;  %v2907_v51 = vpop.f32.mrf.mxu0  ;;  %v874_v15 = vadd.f32 %v3420_v10, %v761_v4  ;;  %v3422_v8 = vld [vmem:[#allocation25_spill] sm:$0xff]  ;;  %v752_v25 = vadd.f32 %v3423_v5, %v639_v32  ;;  %v3429_v4 = vld [vmem:[#allocation20_spill] sm:$0xff] }
 0x18a   : > { %v1307_v24 = vmax.f32 %v880_v50, 0.0  ;;  %v636_v45 = vadd.f32 %v3422_v8, %v2856_v27 }
 0x18b   : > { %1359 = vmatpush.msra.mxu1 %v1319_v6  ;;  %v871_v6 = vadd.f32 %v3424_v44, %v758_v40  ;;  %v1303_v14 = vmax.f32 %v874_v15, 0.0  ;;  %v865_v50 = vadd.f32 %v3429_v4, %v752_v25  ;;  %v3432_v40 = vld [vmem:[#allocation18_spill] sm:$0xff]  ;;  %v3437_v44 = vld [vmem:[#allocation12_spill] sm:$0xff] }
 0x18c   : > { %1152 = vmatmul.f32.gmra.mxu2 %v2746_v18  ;;  %1708 = vmatmul.msk.f32.gmra.mxu0 %vm518_vm0, %v2518_v41  ;;  %v764_v18 = vadd.f32 %v2729_v60, %v651_v57  ;;  %v883_v41 = vadd.f32 %v2555_v13, %v770_v2  ;;  %v2939_v60 = vpop.f32.mrf.mxu3  ;;  %v3414_v13 = vld [vmem:[#allocation31_spill] sm:$0xff]  ;;  %v3426_v57 = vld [vmem:[#allocation46_spill] sm:$0xff] }
 0x18d   : > { %1360 = vmatpush.msra.mxu1 %v1317_v29  ;;  %v642_v36 = vadd.f32 %v3414_v13, %v2856_v27  ;;  %v3425_v29 = vld [vmem:[#allocation22_spill] sm:$0xff]  ;;  %v749_v43 = vadd.f32 %v3426_v57, %v636_v45  ;;  %v3430_v13 = vld [vmem:[#allocation65_spill] sm:$0xff] }
 0x18e   : > { %v877_v7 = vadd.f32 %v3415_v34, %v764_v18  ;;  %v1309_v17 = vmax.f32 %v883_v41, 0.0 }
 0x18f   : > { %1361 = vmatpush.msra.mxu1 %v1315_v54  ;;  %v1105_v63 = vpop.f32.mrf.mxu2  ;;  %v755_v28 = vadd.f32 %v3419_v55, %v642_v36  ;;  %v3431_v36 = vld [vmem:[#allocation8_spill] sm:$0xff]  ;;  %v862_v34 = vadd.f32 %v3432_v40, %v749_v43 }
 0x190   : > { %v2929_v1 = vpop.f32.mrf.mxu1  ;;  %v2931_v42 = vadd.f32 %v1105_v63, %v993_v12  ;;  %v1305_v16 = vmax.f32 %v877_v7, 0.0  ;;  %v633_v12 = vadd.f32 %v3425_v29, %v2856_v27  ;;  %v3428_v63 = vld [vmem:[#allocation44_spill] sm:$0xff]  ;;  %v3439_v29 = vld [vmem:[#allocation13_spill] sm:$0xff] }
 0x191   : > { %1362 = vmatpush.msra.mxu1 %v1313_v3  ;;  %v2937_v62 = vpop.f32.mrf.mxu0  ;;  %v868_v54 = vadd.f32 %v3427_v39, %v755_v28  ;;  %v1295_v55 = vmax.f32 %v862_v34, 0.0  ;;  %v3440_v39 = vld [vmem:[#allocation14_spill] sm:$0xff] }
 0x192   : > { %v746_v9 = vadd.f32 %v3428_v63, %v633_v12 }
 0x193   : > { %1363 = vmatpush.msra.mxu1 %v1311_v59  ;;  %v1301_v59 = vmax.f32 %v871_v6, 0.0  ;;  %v1299_v7 = vmax.f32 %v868_v54, 0.0  ;;  %v3438_v6 = vld [vmem:[#allocation11_spill] sm:$0xff] }
 0x194   : > { %1155 = vmatmul.f32.gmra.mxu2 %v3416_v56  ;;  %1709 = vmatmul.msk.f32.gmra.mxu0 %vm518_vm0, %v3417_v35  ;;  %v1007_v41 = vpop.f32.mrf.mxu3  ;;  %v3434_v56 = vld [vmem:[#allocation16_spill] sm:$0xff] }
 0x195   : > { %1364 = vmatpush.msra.mxu1 %v1309_v17  ;;  %v3433_v17 = vld [vmem:[#allocation7_spill] sm:$0xff]  ;;  %v859_v35 = vadd.f32 %v3434_v56, %v746_v9 }
 0x196   : > { %1057 = vmatmul.f32.gmra.mxu3 %v3433_v17  ;;  %v1005_v17 = vadd.f32 %v2939_v60, %v2779_v58  ;;  %v3443_v60 = vld [vmem:[#allocation19_spill] sm:$0xff] }
 0x197   : > { %1365 = vmatpush.msra.mxu1 %v1307_v24  ;;  %v1108_v0 = vpop.f32.mrf.mxu2  ;;  %v1293_v15 = vmax.f32 %v859_v35, 0.0  ;;  %v3435_v24 = vld [vmem:[#allocation10_spill] sm:$0xff] }
 0x198   : > { %v2959_v2 = vpop.f32.mrf.mxu1  ;;  %v1109_v61 = vadd.f32 %v1108_v0, %v996_v33  ;;  %v1297_v33 = vmax.f32 %v865_v50, 0.0 }
 0x199   : > { %1366 = vmatpush.msra.mxu1 %v1305_v16  ;;  %v1221_v18 = vpop.f32.mrf.mxu0 }
 0x19a   : > { %v2965_v3 = vadd.f32 %v1221_v18, %v1109_v61 }
 0x19b   : > { %1367 = vmatpush.msra.mxu1 %v1303_v14 }
 0x19c   : > { %1158 = vmatmul.f32.gmra.mxu2 %v3430_v13  ;;  %1710 = vmatmul.msk.f32.gmra.mxu0 %vm518_vm0, %v3431_v36  ;;  %v1010_v10 = vpop.f32.mrf.mxu3  ;;  %v3442_v36 = vld [vmem:[#allocation17_spill] sm:$0xff] }
 0x19d   : > { %1368 = vmatpush.msra.mxu1 %v1301_v59  ;;  %v1011_v13 = vadd.f32 %v1010_v10, %v2779_v58 }
 0x19e   : > { %1060 = vmatmul.f32.gmra.mxu3 %v3436_v30 }
 0x19f   : > { %1369 = vmatpush.msra.mxu1 %v1299_v7  ;;  %v2975_v31 = vpop.f32.mrf.mxu2 }
 0x1a0   : > { %v2977_v32 = vpop.f32.mrf.mxu1 }
 0x1a1   : > { %1370 = vmatpush.msra.mxu1 %v1297_v33  ;;  %v2979_v28 = vpop.f32.mrf.mxu0 }
 0x1a3   : > { %1371 = vmatpush.msra.mxu1 %v1295_v55 }
 0x1a4   : > { %1161 = vmatmul.f32.gmra.mxu2 %v2792_v22  ;;  %1711 = vmatmul.msk.f32.gmra.mxu0 %vm518_vm0, %v3435_v24  ;;  %v1013_v25 = vpop.f32.mrf.mxu3 }
 0x1a5   : > { %1372 = vmatpush.msra.mxu1 %v1293_v15 }
 0x1a6   : > { %1063 = vmatmul.f32.gmra.mxu3 %v3438_v6 }
 0x1a7   : > { %v1114_v8 = vpop.f32.mrf.mxu2 }
 0x1a8   : > { %v2985_v45 = vpop.f32.mrf.mxu1 }
 0x1a9   : > { %v2987_v5 = vpop.f32.mrf.mxu0 }
 0x1ac   : > { %1164 = vmatmul.f32.gmra.mxu2 %v2807_v47  ;;  %1712 = vmatmul.msk.f32.gmra.mxu0 %vm518_vm0, %v3437_v44  ;;  %v1016_v61 = vpop.f32.mrf.mxu3 }
 0x1ad   : > { %v1017_v40 = vadd.f32 %v1016_v61, %v2779_v58 }
 0x1af   : > { %v1117_v22 = vpop.f32.mrf.mxu2 }
 0x1b0   : > { %v2993_v16 = vpop.f32.mrf.mxu1 }
 0x1b1   : > { %v1230_v0 = vpop.f32.mrf.mxu0 }
 0x1b4   : > { %1167 = vmatmul.f32.gmra.mxu2 %v2820_v46  ;;  %1713 = vmatmul.msk.f32.gmra.mxu0 %vm518_vm0, %v3439_v29  ;;  %v1019_v47 = vpop.f32.mrf.mxu3  ;;  %v3441_v46 = vld [vmem:[#allocation15_spill] sm:$0xff] }
 0x1b5   : > { %v1020_v61 = vadd.f32 %v1019_v47, %v2779_v58 }
 0x1b7   : > { %v1120_v12 = vpop.f32.mrf.mxu2 }
 0x1b8   : > { %v2998_v57 = vpop.f32.mrf.mxu1 }
 0x1b9   : > { %v1233_v43 = vpop.f32.mrf.mxu0 }
 0x1bc   : > { %1170 = vmatmul.f32.gmra.mxu2 %v2833_v52  ;;  %1714 = vmatmul.msk.f32.gmra.mxu0 %vm518_vm0, %v3440_v39  ;;  %v1022_v63 = vpop.f32.mrf.mxu3  ;;  %v1014_v52 = vadd.f32 %v1013_v25, %v2779_v58  ;;  %v1118_v25 = vadd.f32 %v1117_v22, %v1005_v17  ;;  %v1216_v17 = vadd.f32 %v2907_v51, %v2901_v37  ;;  %v3444_v37 = vld [vmem:[#allocation73_spill] sm:$0xff] }
 0x1bd   : > { %v1207_v51 = vadd.f32 %v3444_v37, %v2835_v23 }
 0x1bf   : > { %v1123_v54 = vpop.f32.mrf.mxu2 }
 0x1c0   : > { %v3003_v14 = vpop.f32.mrf.mxu1  ;;  %v1124_v56 = vadd.f32 %v1123_v54, %v1011_v13 }
 0x1c1   : > { %v1236_v18 = vpop.f32.mrf.mxu0 }
 0x1c2   : > { %v1237_v44 = vadd.f32 %v1236_v18, %v1124_v56 }
 0x1c4   : > { %1173 = vmatmul.f32.gmra.mxu2 %v2848_v19  ;;  %1715 = vmatmul.msk.f32.gmra.mxu0 %vm518_vm0, %v3441_v46  ;;  %v1025_v59 = vpop.f32.mrf.mxu3  ;;  %v1008_v19 = vadd.f32 %v1007_v41, %v2779_v58  ;;  %v999_v41 = vadd.f32 %v2879_v38, %v2779_v58 }
 0x1c6   : > { %v1121_v15 = vadd.f32 %v1120_v12, %v1008_v19  ;;  %v1231_v12 = vadd.f32 %v1230_v0, %v1118_v25 }
 0x1c7   : > { %v1126_v9 = vpop.f32.mrf.mxu2 }
 0x1c8   : > { %v3008_v4 = vpop.f32.mrf.mxu1  ;;  %v1127_v34 = vadd.f32 %v1126_v9, %v1014_v52  ;;  %v1234_v39 = vadd.f32 %v1233_v43, %v1121_v15  ;;  %v1320_v9 = vmax.f32 %v1237_v44, 0.0  ;;  %v1316_v47 = vmax.f32 %v1231_v12, 0.0 }
 0x1c9   : > { %v1239_v50 = vpop.f32.mrf.mxu0 }
 0x1ca   : > { %v1240_v24 = vadd.f32 %v1239_v50, %v1127_v34  ;;  %v1318_v52 = vmax.f32 %v1234_v39, 0.0 }
 0x1cc   : > { %1176 = vmatmul.f32.gmra.mxu2 %v2871_v49  ;;  %1716 = vmatmul.msk.f32.gmra.mxu0 %vm518_vm0, %v3442_v36  ;;  %v3021_v10 = vpop.f32.mrf.mxu3  ;;  %v1002_v49 = vadd.f32 %v2909_v11, %v2779_v58  ;;  %v1322_v54 = vmax.f32 %v1240_v24, 0.0  ;;  %v1112_v11 = vadd.f32 %v2975_v31, %v999_v41  ;;  %v1023_v31 = vadd.f32 %v1022_v63, %v2779_v58 }
 0x1cd   : > { %v1213_v63 = vadd.f32 %v2877_v53, %v2873_v21  ;;  %v3445_v21 = vld [vmem:[#allocation71_spill] sm:$0xff]  ;;  %v3446_v53 = vld [vmem:[#allocation72_spill] sm:$0xff]  ;;  %v1029_v23 = vadd.f32 %v3021_v10, %v2779_v58 }
 0x1ce   : > { %v1115_v29 = vadd.f32 %v1114_v8, %v1002_v49  ;;  %v1225_v43 = vadd.f32 %v2979_v28, %v1112_v11  ;;  %v1310_v28 = vmax.f32 %v2965_v3, 0.0  ;;  %v1306_v49 = vmax.f32 %v1216_v17, 0.0  ;;  %v3452_v17 = vld [vmem:[#allocation38_spill] sm:$0xff] }
 0x1cf   : > { %v1129_v7 = vpop.f32.mrf.mxu2  ;;  %v1304_v3 = vmax.f32 %v1213_v63, 0.0  ;;  %v1204_v25 = vadd.f32 %v3446_v53, %v3445_v21  ;;  %v3453_v63 = vld [vmem:[#allocation42_spill] sm:$0xff] }
 0x1d0   : > { %v3019_v35 = vpop.f32.mrf.mxu1  ;;  %v1130_v33 = vadd.f32 %v1129_v7, %v1017_v40  ;;  %v1228_v18 = vadd.f32 %v2987_v5, %v1115_v29  ;;  %v1219_v40 = vadd.f32 %v2937_v62, %v2931_v42  ;;  %v1312_v19 = vmax.f32 %v1225_v43, 0.0  ;;  %v3450_v29 = vld [vmem:[#allocation68_spill] sm:$0xff] }
 0x1d1   : > { %v1242_v55 = vpop.f32.mrf.mxu0  ;;  %v1026_v42 = vadd.f32 %v1025_v59, %v2779_v58 }
 0x1d2   : > { %v1243_v30 = vadd.f32 %v1242_v55, %v1130_v33  ;;  %v1314_v0 = vmax.f32 %v1228_v18, 0.0  ;;  %v1308_v33 = vmax.f32 %v1219_v40, 0.0  ;;  %v1210_v55 = vadd.f32 %v2852_v26, %v2850_v48  ;;  %v3448_v48 = vld [vmem:[#allocation70_spill] sm:$0xff] }
 0x1d4   : > { %v1324_v6 = vmax.f32 %v1243_v30, 0.0  ;;  %1717 = vmatmul.msk.f32.gmra.mxu0 %vm518_vm0, %v3443_v60  ;;  %v1031_v8 = vpop.f32.mrf.mxu3  ;;  %v1302_v44 = vmax.f32 %v1210_v55, 0.0  ;;  %v1300_v60 = vmax.f32 %v1207_v51, 0.0 }
 0x1d5   : > { %v1032_v43 = vadd.f32 %v1031_v8, %v2779_v58 }
 0x1d6   : > { %1397 = vmatpush.msrb.mxu1 %v1324_v6  ;;  %v3447_v6 = vld [vmem:[#allocation69_spill] sm:$0xff] }
 0x1d7   : > { %v1132_v46 = vpop.f32.mrf.mxu2  ;;  %v1201_v26 = vadd.f32 %v3448_v48, %v3447_v6  ;;  %v3457_v6 = vld [vmem:[#allocation55_spill] sm:$0xff] }
 0x1d8   : > { %v3031_v50 = vpop.f32.mrf.mxu1  ;;  %v1133_v38 = vadd.f32 %v1132_v46, %v1020_v61  ;;  %1398 = vmatpush.msrb.mxu1 %v1322_v54  ;;  %v3449_v61 = vld [vmem:[#allocation67_spill] sm:$0xff]  ;;  %v1298_v54 = vmax.f32 %v1204_v25, 0.0  ;;  %v3456_v25 = vld [vmem:[#allocation52_spill] sm:$0xff] }
 0x1d9   : > { %v1245_v22 = vpop.f32.mrf.mxu0  ;;  %v1198_v39 = vadd.f32 %v3450_v29, %v3449_v61  ;;  %v1296_v12 = vmax.f32 %v1201_v26, 0.0 }
 0x1da   : > { %v3034_v13 = vadd.f32 %v1245_v22, %v1133_v38  ;;  %1399 = vmatpush.msrb.mxu1 %v1320_v9 }
 0x1db   : > { %v1294_v18 = vmax.f32 %v1198_v39, 0.0  ;;  %v3459_v39 = vld [vmem:[#allocation49_spill] sm:$0xff] }
 0x1dc   : > { %1400 = vmatpush.msrb.mxu1 %v1318_v52  ;;  %v1034_v62 = vpop.f32.mrf.mxu3 }
 0x1de   : > { %1401 = vmatpush.msrb.mxu1 %v1316_v47 }
 0x1df   : > { %v1135_v36 = vpop.f32.mrf.mxu2 }
 0x1e0   : > { %v3040_v34 = vpop.f32.mrf.mxu1  ;;  %v1136_v5 = vadd.f32 %v1135_v36, %v1023_v31  ;;  %1402 = vmatpush.msrb.mxu1 %v1314_v0 }
 0x1e1   : > { %v1248_v7 = vpop.f32.mrf.mxu0 }
 0x1e2   : > { %v3045_v56 = vadd.f32 %v1248_v7, %v1136_v5  ;;  %1403 = vmatpush.msrb.mxu1 %v1312_v19  ;;  %v1035_v19 = vadd.f32 %v1034_v62, %v2779_v58  ;;  %v3451_v5 = vld [vmem:[#allocation40_spill] sm:$0xff] }
 0x1e3   : > { %v723_v7 = vadd.f32 %v3451_v5, %v2856_v27 }
 0x1e4   : > { %1404 = vmatpush.msrb.mxu1 %v1310_v28  ;;  %v1037_v11 = vpop.f32.mrf.mxu3  ;;  %v720_v28 = vadd.f32 %v3452_v17, %v2856_v27 }
 0x1e6   : > { %1405 = vmatpush.msrb.mxu1 %v1308_v33  ;;  %v726_v33 = vadd.f32 %v3453_v63, %v2856_v27  ;;  %v3465_v63 = vld [vmem:[#allocation43_spill] sm:$0xff] }
 0x1e7   : > { %v1138_v15 = vpop.f32.mrf.mxu2 }
 0x1e8   : > { %v829_v24 = vpop.f32.mrf.mxu1  ;;  %v1139_v30 = vadd.f32 %v1138_v15, %v1026_v42  ;;  %1406 = vmatpush.msrb.mxu1 %v1306_v49  ;;  %v3454_v15 = vld [vmem:[#allocation36_spill] sm:$0xff] }
 0x1e9   : > { %v1251_v41 = vpop.f32.mrf.mxu0  ;;  %v717_v37 = vadd.f32 %v3454_v15, %v2856_v27  ;;  %v3467_v15 = vld [vmem:[#allocation41_spill] sm:$0xff] }
 0x1ea   : > { %v3056_v59 = vadd.f32 %v1251_v41, %v1139_v30  ;;  %1407 = vmatpush.msrb.mxu1 %v1304_v3  ;;  %v3455_v41 = vld [vmem:[#allocation35_spill] sm:$0xff] }
 0x1eb   : > { %v714_v21 = vadd.f32 %v3455_v41, %v2856_v27  ;;  %v830_v53 = vadd.f32 %v829_v24, %v717_v37 }
 0x1ec   : > { %1408 = vmatpush.msrb.mxu1 %v1302_v44  ;;  %v1040_v36 = vpop.f32.mrf.mxu3 }
 0x1ed   : > { %v827_v29 = vadd.f32 %v3040_v34, %v714_v21  ;;  %v3463_v34 = vld [vmem:[#allocation45_spill] sm:$0xff]  ;;  %v3469_v21 = vld [vmem:[#allocation39_spill] sm:$0xff] }
 0x1ee   : > { %1409 = vmatpush.msrb.mxu1 %v1300_v60  ;;  %v1038_v60 = vadd.f32 %v1037_v11, %v2779_v58  ;;  %v3462_v11 = vld [vmem:[#allocation30_spill] sm:$0xff] }
 0x1ef   : > { %v1141_v46 = vpop.f32.mrf.mxu2 }
 0x1f0   : > { %v832_v9 = vpop.f32.mrf.mxu1  ;;  %v1142_v38 = vadd.f32 %v1141_v46, %v1029_v23  ;;  %1410 = vmatpush.msrb.mxu1 %v1298_v54  ;;  %v3458_v23 = vld [vmem:[#allocation34_spill] sm:$0xff] }
 0x1f1   : > { %v1254_v22 = vpop.f32.mrf.mxu0  ;;  %v833_v51 = vadd.f32 %v832_v9, %v720_v28  ;;  %v711_v61 = vadd.f32 %v3458_v23, %v2856_v27 }
 0x1f2   : > { %v3064_v52 = vadd.f32 %v1254_v22, %v1142_v38  ;;  %1411 = vmatpush.msrb.mxu1 %v1296_v12  ;;  %v3460_v12 = vld [vmem:[#allocation33_spill] sm:$0xff]  ;;  %v3461_v38 = vld [vmem:[#allocation47_spill] sm:$0xff] }
 0x1f3   : > { %v946_v54 = vadd.f32 %v3459_v39, %v833_v51  ;;  %v708_v9 = vadd.f32 %v3460_v12, %v2856_v27  ;;  %v824_v24 = vadd.f32 %v3031_v50, %v711_v61  ;;  %v943_v22 = vadd.f32 %v3461_v38, %v830_v53  ;;  %v3464_v50 = vld [vmem:[#allocation27_spill] sm:$0xff]  ;;  %v3473_v12 = vld [vmem:[#allocation64_spill] sm:$0xff] }
 0x1f4   : > { %1412 = vmatpush.msrb.mxu1 %v1294_v18  ;;  %v1043_v26 = vpop.f32.mrf.mxu3  ;;  %v702_v17 = vadd.f32 %v3464_v50, %v2856_v27 }
 0x1f5   : > { %v1044_v38 = vadd.f32 %v1043_v26, %v2779_v58 }
 0x1f7   : > { %v1144_v10 = vpop.f32.mrf.mxu2 }
 0x1f8   : > { %v835_v47 = vpop.f32.mrf.mxu1  ;;  %v1145_v31 = vadd.f32 %v1144_v10, %v1032_v43 }
 0x1f9   : > { %v1257_v0 = vpop.f32.mrf.mxu0  ;;  %v836_v42 = vadd.f32 %v835_v47, %v723_v7  ;;  %v705_v47 = vadd.f32 %v3462_v11, %v2856_v27 }
 0x1fa   : > { %v3067_v40 = vadd.f32 %v1257_v0, %v1145_v31  ;;  %v821_v31 = vadd.f32 %v3019_v35, %v708_v9  ;;  %v940_v0 = vadd.f32 %v3463_v34, %v827_v29  ;;  %v3466_v35 = vld [vmem:[#allocation24_spill] sm:$0xff]  ;;  %v3477_v34 = vld [vmem:[#allocation59_spill] sm:$0xff] }
 0x1fb   : > { %v949_v44 = vadd.f32 %v3456_v25, %v836_v42  ;;  %v818_v28 = vadd.f32 %v3008_v4, %v705_v47  ;;  %v1349_v42 = vmax.f32 %v943_v22, 0.0  ;;  %v3476_v47 = vld [vmem:[#allocation58_spill] sm:$0xff] }
 0x1fc   : > { %v934_v37 = vadd.f32 %v3467_v15, %v821_v31  ;;  %v1347_v51 = vmax.f32 %v940_v0, 0.0  ;;  %v684_v31 = vadd.f32 %v3476_v47, %v2856_v27 }
 0x1fd   : > { %v1353_v18 = vmax.f32 %v949_v44, 0.0  ;;  %v931_v53 = vadd.f32 %v3469_v21, %v818_v28 }
 0x1fe   : > { %v1343_v61 = vmax.f32 %v934_v37, 0.0  ;;  %v3481_v37 = vld [vmem:[#allocation53_spill] sm:$0xff] }
 0x1ff   : > { %v1147_v8 = vpop.f32.mrf.mxu2 }
 0x200   : > { %v838_v55 = vpop.f32.mrf.mxu1  ;;  %v1148_v49 = vadd.f32 %v1147_v8, %v1035_v19  ;;  %v1351_v19 = vmax.f32 %v946_v54, 0.0  ;;  %v1041_v8 = vadd.f32 %v1040_v36, %v2779_v58 }
 0x201   : > { %v839_v3 = vadd.f32 %v838_v55, %v726_v33  ;;  %v1260_v30 = vpop.f32.mrf.mxu0  ;;  %v937_v33 = vadd.f32 %v3465_v63, %v824_v24  ;;  %v699_v55 = vadd.f32 %v3466_v35, %v2856_v27  ;;  %v1341_v24 = vmax.f32 %v931_v53, 0.0  ;;  %v3479_v63 = vld [vmem:[#allocation57_spill] sm:$0xff] }
 0x202   : > { %v3078_v62 = vadd.f32 %v1260_v30, %v1148_v49  ;;  %v815_v49 = vadd.f32 %v3003_v14, %v702_v17  ;;  %v3468_v30 = vld [vmem:[#allocation21_spill] sm:$0xff]  ;;  %v3478_v17 = vld [vmem:[#allocation56_spill] sm:$0xff] }
 0x203   : > { %v952_v48 = vadd.f32 %v3457_v6, %v839_v3  ;;  %v3108_v3 = vpop.f32.mrf.mxu3  ;;  %v696_v4 = vadd.f32 %v3468_v30, %v2856_v27  ;;  %v812_v41 = vadd.f32 %v2998_v57, %v699_v55  ;;  %v1345_v25 = vmax.f32 %v937_v33, 0.0  ;;  %v3470_v6 = vld [vmem:[#allocation66_spill] sm:$0xff]  ;;  %v3472_v57 = vld [vmem:[#allocation63_spill] sm:$0xff] }
 0x204   : > { %v693_v14 = vadd.f32 %v3470_v6, %v2856_v27  ;;  %v690_v54 = vadd.f32 %v3472_v57, %v2856_v27  ;;  %v681_v28 = vadd.f32 %v3478_v17, %v2856_v27  ;;  %v3480_v55 = vld [vmem:[#allocation54_spill] sm:$0xff] }
 0x205   : > { %v1355_v46 = vmax.f32 %v952_v48, 0.0  ;;  %v809_v48 = vadd.f32 %v2993_v16, %v696_v4  ;;  %v925_v9 = vadd.f32 %v3473_v12, %v812_v41  ;;  %v3474_v16 = vld [vmem:[#allocation60_spill] sm:$0xff]  ;;  %v1848_v12 = vmov 0.00390625  }
 0x206   : > { %v687_v22 = vadd.f32 %v3474_v16, %v2856_v27  ;;  %v3482_v27 = vld [vmem:[#allocation50_spill] sm:$0xff]  ;;  %1373 = vmatmul.f32.vlgmr.msra.gmra.mxu1 %v1848_v12 }
 0x207   : > { %1377 = vmatpush.msra.mxu3 %v1355_v46  ;;  %v1150_v43 = vpop.f32.mrf.mxu2  ;;  %v806_v46 = vadd.f32 %v2985_v45, %v693_v14 }
 0x208   : > { %v1151_v10 = vadd.f32 %v1150_v43, %v1038_v60  ;;  %v3471_v60 = vld [vmem:[#allocation37_spill] sm:$0xff]  ;;  %v800_v45 = vadd.f32 %v2959_v2, %v687_v22  ;;  %v794_v2 = vadd.f32 %v2899_v20, %v681_v28 }
 0x209   : > { %1378 = vmatpush.msra.mxu3 %v1353_v18  ;;  %v1263_v5 = vpop.f32.mrf.mxu0  ;;  %v928_v23 = vadd.f32 %v3471_v60, %v815_v49  ;;  %v803_v18 = vadd.f32 %v2977_v32, %v690_v54  ;;  %v3475_v43 = vld [vmem:[#allocation61_spill] sm:$0xff]  ;;  %v919_v0 = vadd.f32 %v3477_v34, %v806_v46  ;;  %v797_v32 = vadd.f32 %v2929_v1, %v684_v31 }
 0x20a   : > { %v3097_v7 = vadd.f32 %v1263_v5, %v1151_v10  ;;  %v922_v10 = vadd.f32 %v3475_v43, %v809_v48  ;;  %v913_v49 = vadd.f32 %v3480_v55, %v800_v45  ;;  %v907_v4 = vadd.f32 %v3482_v27, %v794_v2  ;;  %v1467_v27 = vld [vmem:[%s3322_s4 + $0xf0] sm:$0xff] }
 0x20b   : > { %1379 = vmatpush.msra.mxu3 %v1351_v19  ;;  %v1339_v11 = vmax.f32 %v928_v23, 0.0  ;;  %v1337_v19 = vmax.f32 %v925_v9, 0.0  ;;  %v1049_v26 = vpop.f32.mrf.mxu3  ;;  %v916_v33 = vadd.f32 %v3479_v63, %v803_v18  ;;  %v1333_v15 = vmax.f32 %v919_v0, 0.0 }
 0x20c   : > { %v1329_v1 = vmax.f32 %v913_v49, 0.0  ;;  %v1050_v34 = vadd.f32 %v1049_v26, %v2779_v58 }
 0x20d   : > { %1380 = vmatpush.msra.mxu3 %v1349_v42  ;;  %v1335_v42 = vmax.f32 %v922_v10, 0.0  ;;  %v1331_v30 = vmax.f32 %v916_v33, 0.0 }
 0x20e   : > { %1413 = vmatmul.f32.vlgmr.msrb.gmra.mxu1 %v1848_v12 }
 0x20f   : > { %1381 = vmatpush.msra.mxu3 %v1347_v51  ;;  %v1153_v36 = vpop.f32.mrf.mxu2  ;;  %v910_v51 = vadd.f32 %v3481_v37, %v797_v32 }
 0x210   : > { %v1154_v44 = vadd.f32 %v1153_v36, %v1041_v8  ;;  %v1325_v36 = vmax.f32 %v907_v4, 0.0 }
 0x211   : > { %1382 = vmatpush.msra.mxu3 %v1345_v25  ;;  %v1266_v29 = vpop.f32.mrf.mxu0  ;;  %v1327_v21 = vmax.f32 %v910_v51, 0.0  ;;  %v1468_v51 = vld [vmem:[%s3322_s4 + $0xf8] sm:$0xff] }
 0x212   : > { %v3118_v39 = vadd.f32 %v1266_v29, %v1154_v44 }
 0x213   : > { %1383 = vmatpush.msra.mxu3 %v1343_v61  ;;  %v1052_v25 = vpop.f32.mrf.mxu3 }
 0x215   : > { %1384 = vmatpush.msra.mxu3 %v1341_v24 }
 0x217   : > { %1385 = vmatpush.msra.mxu3 %v1339_v11  ;;  %v1156_v5 = vpop.f32.mrf.mxu2  ;;  %v1053_v11 = vadd.f32 %v1052_v25, %v2779_v58  ;;  %v1336_v25 = vmax.f32 %v3078_v62, 0.0  ;;  %v1461_v62 = vld [vmem:[%s3322_s4 + $0xc0] sm:$0xff] }
 0x218   : > { %v1157_v50 = vadd.f32 %v1156_v5, %v1044_v38 }
 0x219   : > { %1386 = vmatpush.msra.mxu3 %v1337_v19  ;;  %v1269_v8 = vpop.f32.mrf.mxu0 }
 0x21a   : > { %v3137_v35 = vadd.f32 %v1269_v8, %v1157_v50  ;;  %v1047_v50 = vadd.f32 %v3108_v3, %v2779_v58 }
 0x21b   : > { %1387 = vmatpush.msra.mxu3 %v1335_v42  ;;  %v1055_v6 = vpop.f32.mrf.mxu3 }
 0x21c   : > { %v1056_v18 = vadd.f32 %v1055_v6, %v2779_v58  ;;  %v1342_v4 = vmax.f32 %v3137_v35, 0.0  ;;  %v1464_v35 = vld [vmem:[%s3322_s4 + $0xd8] sm:$0xff]  ;;  %v1328_v6 = vmax.f32 %v3045_v56, 0.0  ;;  %v1451_v56 = vld [vmem:[%s3322_s4 + $0x70] sm:$0xff] }
 0x21d   : > { %1388 = vmatpush.msra.mxu3 %v1333_v15 }
 0x21f   : > { %1389 = vmatpush.msra.mxu3 %v1331_v30  ;;  %v1159_v41 = vpop.f32.mrf.mxu2 }
 0x220   : > { %v1160_v8 = vadd.f32 %v1159_v41, %v1047_v50  ;;  %v1340_v41 = vmax.f32 %v3118_v39, 0.0  ;;  %v1463_v39 = vld [vmem:[%s3322_s4 + $0xd0] sm:$0xff] }
 0x221   : > { %1390 = vmatpush.msra.mxu3 %v1329_v1  ;;  %v1272_v53 = vpop.f32.mrf.mxu0  ;;  %v1466_v1 = vld [vmem:[%s3322_s4 + $0xe8] sm:$0xff] }
 0x222   : > { %v1273_v26 = vadd.f32 %v1272_v53, %v1160_v8  ;;  %v1338_v53 = vmax.f32 %v3097_v7, 0.0  ;;  %v1462_v7 = vld [vmem:[%s3322_s4 + $0xc8] sm:$0xff] }
 0x223   : > { %1391 = vmatpush.msra.mxu3 %v1327_v21  ;;  %v1058_v60 = vpop.f32.mrf.mxu3  ;;  %v1465_v21 = vld [vmem:[%s3322_s4 + $0xe0] sm:$0xff] }
 0x224   : > { %v1059_v16 = vadd.f32 %v1058_v60, %v2779_v58  ;;  %v1344_v30 = vmax.f32 %v1273_v26, 0.0  ;;  %v1448_v60 = vld [vmem:[%s3322_s4 + $0x58] sm:$0xff] }
 0x225   : > { %1392 = vmatpush.msra.mxu3 %v1325_v36  ;;  %v1334_v36 = vmax.f32 %v3067_v40, 0.0  ;;  %v1460_v40 = vld [vmem:[%s3322_s4 + $0xb8] sm:$0xff] }
 0x226   : > { %1393 = vmatmul.f32.vlgmr.msra.gmra.mxu3 %v1848_v12 }
 0x227   : > { %v1162_v20 = vpop.f32.mrf.mxu2 }
 0x228   : > { %v1163_v63 = vadd.f32 %v1162_v20, %v1050_v34  ;;  %v1332_v20 = vmax.f32 %v3064_v52, 0.0  ;;  %v1459_v52 = vld [vmem:[%s3322_s4 + $0xb0] sm:$0xff]  ;;  %v1454_v34 = vld [vmem:[%s3322_s4 + $0x88] sm:$0xff] }
 0x229   : > { %v1275_v44 = vpop.f32.mrf.mxu0 }
 0x22a   : > { %v1276_v49 = vadd.f32 %v1275_v44, %v1163_v63  ;;  %v1330_v44 = vmax.f32 %v3056_v59, 0.0  ;;  %v1452_v59 = vld [vmem:[%s3322_s4 + $0x78] sm:$0xff]  ;;  %v1542_v63 = vld [vmem:[%s3325_s7] sm:$0xff] }
 0x22b   : > { %v1061_v57 = vpop.f32.mrf.mxu3 }
 0x22c   : > { %v1062_v38 = vadd.f32 %v1061_v57, %v2779_v58  ;;  %v1346_v3 = vmax.f32 %v1276_v49, 0.0  ;;  %v1444_v57 = vld [vmem:[%s3322_s4 + $0x38] sm:$0xff] }
 0x22f   : > { %v1165_v14 = vpop.f32.mrf.mxu2 }
 0x230   : > { %v1166_v17 = vadd.f32 %v1165_v14, %v1053_v11  ;;  %v1326_v14 = vmax.f32 %v3034_v13, 0.0  ;;  %v1449_v13 = vld [vmem:[%s3322_s4 + $0x60] sm:$0xff]  ;;  %v1455_v11 = vld [vmem:[%s3322_s4 + $0x90] sm:$0xff] }
 0x231   : > { %v1278_v48 = vpop.f32.mrf.mxu0 }
 0x232   : > { %v1279_v2 = vadd.f32 %v1278_v48, %v1166_v17  ;;  %v1450_v48 = vld [vmem:[%s3322_s4 + $0x68] sm:$0xff]  ;;  %v1545_v17 = vld [vmem:[%s3325_s7 + $0x18] sm:$0xff] }
 0x233   : > { %v1064_v24 = vpop.f32.mrf.mxu3 }
 0x234   : > { %v1065_v22 = vadd.f32 %v1064_v24, %v2779_v58  ;;  %v1348_v37 = vmax.f32 %v1279_v2, 0.0  ;;  %v1470_v58 = vld [vmem:[%s3323_s5] sm:$0x3f]  ;;  %v1439_v24 = vld [vmem:[%s3322_s4 + $0x10] sm:$0xff] }
 0x235   : > { %1718 = vmatpush.msk.msra.mxu1 %vm1475_vm1, %v1470_v58 }
 0x237   : > { %v1168_v23 = vpop.f32.mrf.mxu2  ;;  %1519 = vmatpush.msrb.mxu1 %v1468_v51 }
 0x238   : > { %v1169_v0 = vadd.f32 %v1168_v23, %v1056_v18  ;;  %v1447_v23 = vld [vmem:[%s3322_s4 + $0x50] sm:$0xff]  ;;  %v1457_v18 = vld [vmem:[%s3322_s4 + $0xa0] sm:$0xff] }
 0x239   : > { %v1281_v61 = vpop.f32.mrf.mxu0  ;;  %1520 = vmatpush.msrb.mxu1 %v1467_v27 }
 0x23a   : > { %v1282_v33 = vadd.f32 %v1281_v61, %v1169_v0  ;;  %v1446_v61 = vld [vmem:[%s3322_s4 + $0x48] sm:$0xff]  ;;  %v1453_v0 = vld [vmem:[%s3322_s4 + $0x80] sm:$0xff] }
 0x23b   : > { %1521 = vmatpush.msrb.mxu1 %v1466_v1 }
 0x23c   : > { %v1350_v15 = vmax.f32 %v1282_v33, 0.0 }
 0x23d   : > { %1522 = vmatpush.msrb.mxu1 %v1465_v21 }
 0x23f   : > { %v1171_v29 = vpop.f32.mrf.mxu2  ;;  %1523 = vmatpush.msrb.mxu1 %v1464_v35 }
 0x240   : > { %v1172_v47 = vadd.f32 %v1171_v29, %v1059_v16  ;;  %v1445_v29 = vld [vmem:[%s3322_s4 + $0x40] sm:$0xff]  ;;  %v1458_v16 = vld [vmem:[%s3322_s4 + $0xa8] sm:$0xff] }
 0x241   : > { %v1284_v54 = vpop.f32.mrf.mxu0  ;;  %1524 = vmatpush.msrb.mxu1 %v1463_v39 }
 0x242   : > { %v1285_v28 = vadd.f32 %v1284_v54, %v1172_v47  ;;  %v1443_v54 = vld [vmem:[%s3322_s4 + $0x30] sm:$0xff] }
 0x243   : > { %1525 = vmatpush.msrb.mxu1 %v1462_v7 }
 0x244   : > { %v1352_v55 = vmax.f32 %v1285_v28, 0.0  ;;  %v1544_v28 = vld [vmem:[%s3325_s7 + $0x10] sm:$0xff] }
 0x245   : > { %1526 = vmatpush.msrb.mxu1 %v1461_v62 }
 0x247   : > { %v1174_v46 = vpop.f32.mrf.mxu2  ;;  %1527 = vmatpush.msrb.mxu1 %v1460_v40 }
 0x248   : > { %v1175_v43 = vadd.f32 %v1174_v46, %v1062_v38  ;;  %v1442_v46 = vld [vmem:[%s3322_s4 + $0x28] sm:$0xff] }
 0x249   : > { %v1287_v9 = vpop.f32.mrf.mxu0  ;;  %1528 = vmatpush.msrb.mxu1 %v1459_v52  ;;  %v1438_v38 = vld [vmem:[%s3322_s4 + $0x8] sm:$0xff] }
 0x24a   : > { %v1288_v19 = vadd.f32 %v1287_v9, %v1175_v43  ;;  %v1440_v9 = vld [vmem:[%s3322_s4 + $0x18] sm:$0xff]  ;;  %v1469_v43 = vld [vmem:[%s343_s26] sm:$0x1]  ;;  %s334_s26 = sand.u32 1, %s1838_s10  }
 0x24b   : > { %1529 = vmatpush.msrb.mxu1 %v1458_v16  ;;  %s335_s16 = scalar_lea.vmem [#allocation2], %s334_s26  ;;  %s1573_s27 = scalar_lea.sflag [#allocation3], %s334_s26 }
 0x24c   : > { %v1354_v42 = vmax.f32 %v1288_v19, 0.0  ;;  %1719 = vmatmul.msk.f32.vlgmr.msra.gmra.mxu1 %vm1471_vm2, %v1469_v43  ;;  %s1583_s24 = sshll.u32 %s335_s16, 4  ;;  %s1584_s24 = int_to_ptr.vmem [resolvable:$true] %s1583_s24 }
 0x24d   : > { %1530 = vmatpush.msrb.mxu1 %v1457_v18 }
 0x24f   : > { %v1177_v10 = vpop.f32.mrf.mxu2 }
 0x250   : > { %v1178_v31 = vadd.f32 %v1177_v10, %v1065_v22  ;;  %v1437_v22 = vld [vmem:[%s3322_s4] sm:$0xff]  ;;  %v1456_v10 = vld [vmem:[%s3322_s4 + $0x98] sm:$0xff] }
 0x251   : > { %v1290_v45 = vpop.f32.mrf.mxu0  ;;  %1531 = vmatpush.msrb.mxu1 %v1456_v10 }
 0x252   : > { %v1291_v5 = vadd.f32 %v1290_v45, %v1178_v31 }
 0x253   : > { %1532 = vmatpush.msrb.mxu1 %v1455_v11 }
 0x254   : > { %v1356_v32 = vmax.f32 %v1291_v5, 0.0 }
 0x255   : > { %1533 = vmatpush.msrb.mxu1 %v1454_v34 }
 0x256   : > { %1417 = vmatpush.msrb.mxu3 %v1356_v32  ;;  %v1543_v32 = vld [vmem:[%s3325_s7 + $0x8] sm:$0xff] }
 0x257   : > { %1534 = vmatpush.msrb.mxu1 %v1453_v0 }
 0x258   : > { %1418 = vmatpush.msrb.mxu3 %v1354_v42 }
 0x25a   : > { %1419 = vmatpush.msrb.mxu3 %v1352_v55  ;;  %v1539_v55 = vld [vmem:[%s3324_s6] sm:$0x1] }
 0x25c   : > { %1420 = vmatpush.msrb.mxu3 %v1350_v15 }
 0x25e   : > { %1421 = vmatpush.msrb.mxu3 %v1348_v37  ;;  %v1546_v37 = vld [vmem:[%s3326_s8] sm:$0x1] }
 0x260   : > { %1422 = vmatpush.msrb.mxu3 %v1346_v3 }
 0x262   : > { %1423 = vmatpush.msrb.mxu3 %v1344_v30 }
 0x264   : > { %1424 = vmatpush.msrb.mxu3 %v1342_v4 }
 0x266   : > { %1425 = vmatpush.msrb.mxu3 %v1340_v41 }
 0x268   : > { %1426 = vmatpush.msrb.mxu3 %v1338_v53 }
 0x26a   : > { %1427 = vmatpush.msrb.mxu3 %v1336_v25 }
 0x26c   : > { %1428 = vmatpush.msrb.mxu3 %v1334_v36 }
 0x26e   : > { %1429 = vmatpush.msrb.mxu3 %v1332_v20 }
 0x270   : > { %1430 = vmatpush.msrb.mxu3 %v1330_v44 }
 0x272   : > { %1431 = vmatpush.msrb.mxu3 %v1328_v6 }
 0x274   : > { %1432 = vmatpush.msrb.mxu3 %v1326_v14 }
 0x275   : > { %1433 = vmatmul.f32.vlgmr.msrb.gmra.mxu3 %v1848_v12  ;;  %v1441_v12 = vld [vmem:[%s3322_s4 + $0x20] sm:$0xff] }
 0x276   : > { %1499 = vmatpush.msra.mxu3 %v1452_v59 }
 0x278   : > { %1500 = vmatpush.msra.mxu3 %v1451_v56 }
 0x27a   : > { %1501 = vmatpush.msra.mxu3 %v1450_v48 }
 0x27c   : > { %1502 = vmatpush.msra.mxu3 %v1449_v13 }
 0x27e   : > { %1503 = vmatpush.msra.mxu3 %v1448_v60 }
 0x280   : > { %1504 = vmatpush.msra.mxu3 %v1447_v23 }
 0x282   : > { %1505 = vmatpush.msra.mxu3 %v1446_v61 }
 0x283   : > { %v1374_v47 = vpop.f32.mrf.mxu1 }
 0x284   : > { %1506 = vmatpush.msra.mxu3 %v1445_v29 }
 0x286   : > { %1507 = vmatpush.msra.mxu3 %v1444_v57 }
 0x288   : > { %1508 = vmatpush.msra.mxu3 %v1443_v54 }
 0x28a   : > { %1509 = vmatpush.msra.mxu3 %v1442_v46 }
 0x28b   : > { %v1414_v19 = vpop.f32.mrf.mxu1 }
 0x28c   : > { %1510 = vmatpush.msra.mxu3 %v1441_v12 }
 0x28e   : > { %1511 = vmatpush.msra.mxu3 %v1440_v9 }
 0x290   : > { %1512 = vmatpush.msra.mxu3 %v1439_v24 }
 0x292   : > { %1513 = vmatpush.msra.mxu3 %v1438_v38 }
 0x294   : > { %1514 = vmatpush.msra.mxu3 %v1437_v22 }
 0x296   : > { %1562 = vmatpush.msrb.mxu3 %v1545_v17 }
 0x298   : > { %1563 = vmatpush.msrb.mxu3 %v1544_v28 }
 0x29a   : > { %1564 = vmatpush.msrb.mxu3 %v1543_v32 }
 0x29c   : > { %1565 = vmatpush.msrb.mxu3 %v1542_v63 }
 0x2a9   : > { %v1394_v31 = vpop.f32.mrf.mxu3 }
 0x2aa   : > { %v1395_v45 = vadd.f32 %v1394_v31, %v1374_v47 }
 0x2ac   : > { %1515 = vmatmul.f32.vlgmr.msra.gmra.mxu3 %v1395_v45 }
 0x2c9   : > { %v1496_v33 = vpop.f32.mrf.mxu1 }
 0x2f8   : > { %v1434_v5 = vpop.f32.mrf.mxu3 }
 0x2f9   : > { %v1435_v50 = vadd.f32 %v1434_v5, %v1414_v19 }
 0x2fb   : > { %1535 = vmatmul.f32.vlgmr.msrb.gmra.mxu1 %v1435_v50 }
 0x32f   : > { %v1516_v42 = vpop.f32.mrf.mxu3 }
 0x330   : > { %v1517_v8 = vadd.f32 %v1516_v42, %v1496_v33 }
 0x378   : > { %v1536_v2 = vpop.f32.mrf.mxu1 }
 0x379   : > { %v1537_v49 = vadd.f32 %v1536_v2, %v1517_v8 }
 0x37b   : > { %v1540_v15 = vadd.f32 %v1539_v55, %v1537_v49 }
 0x37d   : > { %v1541_v26 = vmax.f32 %v1540_v15, 0.0 }
 0x37f   : > { %1720 = vmatmul.msk.f32.vlgmr.msrb.gmra.mxu3 %vm518_vm0, %v1541_v26 }
 0x402   : > { %v1567_v58 = vpop.f32.mrf.mxu3 }
 0x403   : > { %v1568_v3 = vadd.f32 %v1567_v58, %v1546_v37 }
 0x405   : > { %1571 = vst.msk [vmem:[%s335_s16] sm:$0x1] %vm1570_vm3, %v1568_v3 }
 0x406   : > { %1811 = shalt.err (!%p1808_p3)
}
 0x407   : > { %1744 = dma.vmem_to_hbm [thread:$0]  (%p1937_p5), %s1584_s24, 16, %s1586_s25, %s1573_s27  }
 0x408 PF: > { %p1750_p4 = scmp.ge.s32.totalorder %s1846_s12, 2  ;;  %s1597_s26 = sand.u32 1, %s1834_s30  }
 0x409   : > { %s1598_s23 = scalar_lea.sflag [#allocation3], %s1597_s26 }
 0x40a   : > { %p1747_p7 = pnand %p1750_p4, %p1941_p6 }
 0x40c   : > { %p1748_p8 = pneg %p1747_p7 }
 0x40e   : > { %1829 = dma.done.wait (%p1748_p8), %s1598_s23, 16  }
 0x40f   : > { %1831 = vsyncadd (%p1748_p8), %s1598_s23, 4294967280  ;;  %p19_p9 = scmp.ge.s32.totalorder %s1924_s15, 4   ;;  %s3483_s30 = smov %s1838_s10 }
 0x410   : > { %s3484_s10 = smov %s1842_s11  ;;  %s3485_s11 = smov %s1935_s18 }
 0x411   : > { %s3486_s12 = smov %s1924_s15  ;;  %21 = sbr.rel (!%p19_p9) target bundleno = 3 (0x3), region = 94 }
 0x416   :  { %1603 = vsyncpa [#allocation3], 1 }
 0x417   :  { %1605 = vsyncpa [#allocation3 + $0x1], 1 }

</bundles_post_ra>
